<compile_context>
chip_gen: v5e
topology: v5e:2x2
jax: 0.10.0
libtpu: 0.0.40
codegen_flags: <defaults>
</compile_context>

<pallas_src>
import jax
import jax.numpy as jnp
from jax.experimental import pallas as pl
from jax.experimental.pallas import tpu as pltpu


# ----------------------------------------------------------------------------
# Kernels
# ----------------------------------------------------------------------------
def gru_kernel(prev_ref, cond_ref, hinit_ref,
               wexp_ref, bexp_ref,
               wih_ref, whh_ref, bx_ref, bhn_ref,
               seq_out_ref, hid_ref,
               seq_ref, gx_ref):
    """input_expand + conditioning + stacked GRU for one (batch-tile, time-chunk).

    prev_ref : (Tc, Bt, S)  f32      cond_ref: (Tc, Bt, D) f32
    hinit_ref: (NR, Bt, D) f32
    wexp_ref : (S, D) bf16           bexp_ref: (1, D) f32
    wih_ref  : (NR, D, 3D) bf16      whh_ref : (NR, D, 3D) bf16
    bx_ref   : (NR, 1, 3D) f32 (b_ir+b_hr, b_iz+b_hz, b_in)
    bhn_ref  : (NR, 1, D) f32
    seq_out  : (Tc, Bt, D) bf16 (last layer outputs)
    hid_ref  : (NR, Bt, D) f32  (resident accumulator across time chunks)
    scratch  : seq_ref (Tc, Bt, D) bf16, gx_ref (Tc, Bt, 3D) f32
    """
    Tc, Bt, S = prev_ref.shape
    D = cond_ref.shape[2]
    NR = hinit_ref.shape[0]
    D2 = 2 * D

    # First time-chunk for this batch tile: seed the resident hidden state.
    @pl.when(pl.program_id(1) == 0)
    def _():
        hid_ref[...] = hinit_ref[...]

    # ---- input_expand (Conv1d k=1 == matmul) + conditioning add -------------
    x = prev_ref[...].reshape(Tc * Bt, S).astype(jnp.bfloat16)
    inp = jnp.dot(x, wexp_ref[...], preferred_element_type=jnp.float32)
    inp = inp + bexp_ref[...]
    seq_ref[...] = (inp.reshape(Tc, Bt, D) + cond_ref[...]).astype(jnp.bfloat16)

    # ---- stacked GRU, PyTorch gate order (r, z, n) ---------------------------
    for l in range(NR):
        # Hoisted input-side projection: one (Tc*Bt, D) @ (D, 3D) matmul with
        # the foldable biases added once, outside the recurrence.
        layer_in = seq_ref[...].reshape(Tc * Bt, D)
        gx = jnp.dot(layer_in, wih_ref[l], preferred_element_type=jnp.float32)
        gx_ref[...] = (gx + bx_ref[l]).reshape(Tc, Bt, 3 * D)

        w_hh_l = whh_ref[l]            # (D, 3D) bf16, loaded once per layer
        b_hn_l = bhn_ref[l]            # (1, D) f32
        out_l = seq_out_ref if l == NR - 1 else seq_ref

        def step(t, h):
            gx_t = gx_ref[t]                                     # (Bt, 3D) f32
            gh = jnp.dot(h.astype(jnp.bfloat16), w_hh_l,
                         preferred_element_type=jnp.float32)     # (Bt, 3D) f32
            rz = jax.nn.sigmoid(gx_t[:, :D2] + gh[:, :D2])
            r = rz[:, :D]
            z = rz[:, D:]
            n = jnp.tanh(gx_t[:, D2:] + r * (gh[:, D2:] + b_hn_l))
            h_new = n + z * (h - n)          # == (1 - z) * n + z * h
            out_l[t] = h_new.astype(out_l.dtype)
            return h_new

        hid_ref[l] = jax.lax.fori_loop(0, Tc, step, hid_ref[l])


def upsample_kernel(seq_ref, wup_ref, bup_ref, out_ref):
    """LearnedUpsampling1d tile: one (Bt*Tt, D) @ (D, k_blk*D) dot + hoisted
    bias, written in the final batch-first layout with lane-dense stores.

    seq_ref: (Tt, Bt, D) bf16   wup_ref: (D, k_blk*D) bf16   bup_ref: (1, k_blk*D) f32
    out_ref: (Bt, Tt, k_blk, D) bf16
    """
    Tt, Bt, D = seq_ref.shape
    k_blk = out_ref.shape[2]
    # One cheap relayout of the small bf16 input (lane dim unchanged).
    x = jnp.transpose(seq_ref[...], (1, 0, 2)).reshape(Bt * Tt, D)   # (Bt*Tt, D)
    y = jnp.dot(x, wup_ref[...], preferred_element_type=jnp.float32)  # (Bt*Tt, k_blk*D)
    y = y + bup_ref[...]
    for k in range(k_blk):   # static-index, lane-dense stores with M = Bt*Tt
        out_ref[:, :, k, :] = (y[:, k * D:(k + 1) * D]
                               .reshape(Bt, Tt, D).astype(out_ref.dtype))


# ----------------------------------------------------------------------------
# Hardware / tiling helpers
# ----------------------------------------------------------------------------
def _vmem_capacity_bytes():
    try:
        cap = getattr(pltpu.get_tpu_info(), "vmem_capacity_bytes", None)
        if cap:
            return int(cap)
    except Exception:
        pass
    try:
        kind = jax.devices()[0].device_kind.lower()
    except Exception:
        kind = ""
    if "v7" in kind:
        return 64 * 1024 * 1024
    return 128 * 1024 * 1024


def _num_tensorcores():
    """TensorCores driven by a single pallas_call (megacore)."""
    try:
        kind = jax.devices()[0].device_kind.lower()
    except Exception:
        return 1
    if any(s in kind for s in ("lite", "v5e", "v6e", "v2", "v3")):
        return 1          # single-TensorCore parts: don't split the batch
    return 2              # v4 / v5p / v7x-class megacore parts


def _pick_b_tile(B, n_cores):
    """Batch tile: split only on multi-TC parts; tile must be %8 or == B."""
    if n_cores <= 1 or B % n_cores != 0:
        return B
    tile = B // n_cores
    if tile % 8 == 0:
        return tile
    return B


def _largest_divisor_leq(n, cap):
    cap = min(cap, n)
    for d in range(cap, 0, -1):
        if n % d == 0:
            return d
    return n


def _pick_k_block(frame_size, dim, vmem_cap, weight_bytes_per_el=2):
    """w_up column tile (in frame positions): block fits a fraction of VMEM."""
    valid = [k for k in range(1, frame_size + 1)
             if frame_size % k == 0
             and (k == frame_size or (k % 8 == 0 and (k * dim) % 128 == 0))]
    budget = max(2 << 20, vmem_cap // 4)
    fitting = [k for k in valid if dim * k * dim * weight_bytes_per_el <= budget]
    return max(fitting) if fitting else min(valid)


def _gru_vmem_limit(Tc, b_tile, S, D, NR, cap, single_buffer_weights):
    f32, bf16 = 4, 2
    wbuf = 1 if single_buffer_weights else 2
    io = (2 * Tc * b_tile * S * f32            # prev (double-buffered)
          + 2 * Tc * b_tile * D * f32          # cond
          + 2 * NR * b_tile * D * f32          # hinit
          + 2 * Tc * b_tile * D * bf16         # seq_out
          + 2 * NR * b_tile * D * f32)         # hid accumulator
    weights = wbuf * (S * D * bf16 + D * f32
                      + 2 * NR * D * 3 * D * bf16
                      + NR * 3 * D * f32 + NR * D * f32)
    scratch = Tc * b_tile * D * bf16 + Tc * b_tile * 3 * D * f32
    need = io + weights + scratch
    limit = max(32 << 20, int(need * 1.5) + (8 << 20))
    return int(min(limit, cap - (12 << 20)))


def _ups_vmem_limit(Tt, b_tile, D, k_blk, cap, single_buffer_weights):
    f32, bf16 = 4, 2
    wbuf = 1 if single_buffer_weights else 2
    need = (2 * Tt * b_tile * D * bf16
            + wbuf * (D * k_blk * D * bf16 + k_blk * D * f32)
            + 2 * b_tile * Tt * k_blk * D * bf16)
    limit = max(32 << 20, int(need * 1.5) + (8 << 20))
    return int(min(limit, cap - (12 << 20)))


def _weight_spec_factory(single_buffer):
    """BlockSpecs for grid-invariant weights; optionally single-buffered."""
    if single_buffer:
        def make(shape, index_map):
            return pl.BlockSpec(shape, index_map, pipeline_mode=pl.Buffered(1))
    else:
        def make(shape, index_map):
            return pl.BlockSpec(shape, index_map)
    return make


# ----------------------------------------------------------------------------
# Parameter preparation (fused layouts, bf16 matmul weights)
# ----------------------------------------------------------------------------
def _prepare_kernel_params(params, compute_dtype=jnp.bfloat16):
    w_ih, w_hh = params["w_ih"], params["w_hh"]      # (NR, 3, D, D), gates (r,z,n)
    b_ih, b_hh = params["b_ih"], params["b_hh"]      # (NR, 3, 1, D)
    NR, _, D, _ = w_ih.shape

    def cat_gates(w):                                # -> (NR, D, 3D)
        return jnp.transpose(w, (0, 2, 1, 3)).reshape(NR, D, 3 * D)

    # fold b_ir+b_hr, b_iz+b_hz into the hoisted projection; keep b_in there too.
    b_x = jnp.concatenate([b_ih[:, :2] + b_hh[:, :2], b_ih[:, 2:3]], axis=1)
    b_x = jnp.transpose(b_x, (0, 2, 1, 3)).reshape(NR, 1, 3 * D)

    return dict(
        w_exp=params["w_exp"].astype(compute_dtype),
        b_exp=params["b_exp"].astype(jnp.float32),
        w_ih=cat_gates(w_ih).astype(compute_dtype),
        w_hh=cat_gates(w_hh).astype(compute_dtype),
        b_x=b_x.astype(jnp.float32),
        b_hn=b_hh[:, 2].astype(jnp.float32),          # (NR, 1, D), stays inside r*(.)
        w_up=params["w_up"].astype(compute_dtype),
        b_up=params["b_up"].astype(jnp.float32),
    )


# ----------------------------------------------------------------------------
# Wrapper
# ----------------------------------------------------------------------------
def frame_level_rnn(prev_samples, upper_tier_conditioning, hidden, params, frame_size):
    """prev_samples: (B, T, n_frame_samples); upper_tier_conditioning: (B, T, dim)."""
    B, T, S = prev_samples.shape
    D = params["w_exp"].shape[1]
    NR = params["w_ih"].shape[0]

    if hidden is None:   # hidden=None path of the PyTorch forward
        hidden = jnp.broadcast_to(params["h0"][:, None, :], (NR, B, D))
    hidden = hidden.astype(jnp.float32)

    kp = _prepare_kernel_params(params)

    prev_tm = jnp.transpose(prev_samples, (1, 0, 2)).astype(jnp.float32)            # (T, B, S)
    cond_tm = jnp.transpose(upper_tier_conditioning, (1, 0, 2)).astype(jnp.float32)  # (T, B, D)

    n_cores = _num_tensorcores()
    vmem_cap = _vmem_capacity_bytes()

    b_tile = _pick_b_tile(B, n_cores)
    nb = B // b_tile

    # ---------------- GRU call: grid = (batch tiles, time chunks) ------------
    t_gru = _largest_divisor_leq(T, 64)        # bounds all O(T) VMEM buffers
    n_tc = T // t_gru

    gru_cost = pl.CostEstimate(
        flops=int(2 * T * B * D * (S + NR * 6 * D)),
        transcendentals=int(T * B * NR * 3 * D),
        bytes_accessed=int(4 * T * B * (S + D) + 8 * NR * B * D
                           + 2 * (S * D + NR * 6 * D * D) + 2 * T * B * D),
    )

    def run_gru(single_buffer_weights):
        wspec = _weight_spec_factory(single_buffer_weights)
        limit = _gru_vmem_limit(t_gru, b_tile, S, D, NR, vmem_cap,
                                single_buffer_weights)
        return pl.pallas_call(
            gru_kernel,
            grid=(nb, n_tc),
            out_shape=(jax.ShapeDtypeStruct((T, B, D), jnp.bfloat16),
                       jax.ShapeDtypeStruct((NR, B, D), jnp.float32)),
            in_specs=[
                pl.BlockSpec((t_gru, b_tile, S), lambda bi, tc: (tc, bi, 0)),
                pl.BlockSpec((t_gru, b_tile, D), lambda bi, tc: (tc, bi, 0)),
                pl.BlockSpec((NR, b_tile, D), lambda bi, tc: (0, bi, 0)),
                wspec(kp["w_exp"].shape, lambda bi, tc: (0, 0)),
                wspec(kp["b_exp"].shape, lambda bi, tc: (0, 0)),
                wspec(kp["w_ih"].shape, lambda bi, tc: (0, 0, 0)),
                wspec(kp["w_hh"].shape, lambda bi, tc: (0, 0, 0)),
                wspec(kp["b_x"].shape, lambda bi, tc: (0, 0, 0)),
                wspec(kp["b_hn"].shape, lambda bi, tc: (0, 0, 0)),
            ],
            out_specs=(
                pl.BlockSpec((t_gru, b_tile, D), lambda bi, tc: (tc, bi, 0)),
                pl.BlockSpec((NR, b_tile, D), lambda bi, tc: (0, bi, 0)),
            ),
            scratch_shapes=[
                pltpu.VMEM((t_gru, b_tile, D), jnp.bfloat16),       # layer-output seq
                pltpu.VMEM((t_gru, b_tile, 3 * D), jnp.float32),    # hoisted gate_x
            ],
            compiler_params=pltpu.CompilerParams(
                dimension_semantics=("parallel", "arbitrary"),
                vmem_limit_bytes=limit),
            cost_estimate=gru_cost,
        )(prev_tm, cond_tm, hidden,
          kp["w_exp"], kp["b_exp"], kp["w_ih"], kp["w_hh"], kp["b_x"], kp["b_hn"])

    try:
        seq_tm, hid_out = run_gru(True)
    except Exception:           # fallback if Buffered(1) unsupported in this JAX
        seq_tm, hid_out = run_gru(False)

    # ------------- LearnedUpsampling: time-blocked fused matmul, bf16 out ----
    k_blk = _pick_k_block(frame_size, D, vmem_cap)
    nk = frame_size // k_blk
    t_up = _largest_divisor_leq(T, 32)
    n_tt = T // t_up

    ups_cost = pl.CostEstimate(
        flops=int(2 * T * B * D * frame_size * D),
        transcendentals=0,
        bytes_accessed=int(2 * T * B * D + 2 * D * frame_size * D
                           + 4 * frame_size * D + 2 * B * T * frame_size * D),
    )

    def run_upsample(single_buffer_weights):
        wspec = _weight_spec_factory(single_buffer_weights)
        limit = _ups_vmem_limit(t_up, b_tile, D, k_blk, vmem_cap,
                                single_buffer_weights)
        return pl.pallas_call(
            upsample_kernel,
            grid=(nb, nk, n_tt),   # t innermost -> each w_up block DMA'd once per (bi, ki)
            out_shape=jax.ShapeDtypeStruct((B, T, frame_size, D), jnp.bfloat16),
            in_specs=[
                pl.BlockSpec((t_up, b_tile, D), lambda bi, ki, tt: (tt, bi, 0)),
                wspec((D, k_blk * D), lambda bi, ki, tt: (0, ki)),
                wspec((1, k_blk * D), lambda bi, ki, tt: (0, ki)),
            ],
            out_specs=pl.BlockSpec((b_tile, t_up, k_blk, D),
                                   lambda bi, ki, tt: (bi, tt, ki, 0)),
            compiler_params=pltpu.CompilerParams(
                dimension_semantics=("parallel", "parallel", "arbitrary"),
                vmem_limit_bytes=limit),
            cost_estimate=ups_cost,
        )(seq_tm, kp["w_up"], kp["b_up"])

    try:
        out4 = run_upsample(True)
    except Exception:
        out4 = run_upsample(False)

    # (B, T, frame_size, D) -> (B, T*frame_size, D): merge of adjacent dims (free).
    out = out4.reshape(B, T * frame_size, D)
    return out, hid_out


# ----------------------------------------------------------------------------
# Pure-JAX reference (PyTorch semantics) for validation
# ----------------------------------------------------------------------------
def reference_forward(prev_samples, cond, hidden, params, frame_size,
                      matmul_dtype=jnp.float32):
    B, T, S = prev_samples.shape
    D = params["w_exp"].shape[1]
    NR = params["w_ih"].shape[0]
    if hidden is None:
        hidden = jnp.broadcast_to(params["h0"][:, None, :], (NR, B, D))

    def mm(a, b):
        return jnp.dot(a.astype(matmul_dtype), b.astype(matmul_dtype),
                       preferred_element_type=jnp.float32)

    inp = mm(prev_samples.reshape(B * T, S), params["w_exp"]) + params["b_exp"][0]
    seq = inp.reshape(B, T, D) + cond

    new_hidden = []
    for l in range(NR):
        h = hidden[l]
        outs = []
        for t in range(T):
            x_t = seq[:, t, :]
            r = jax.nn.sigmoid(mm(x_t, params["w_ih"][l, 0]) + params["b_ih"][l, 0]
                               + mm(h, params["w_hh"][l, 0]) + params["b_hh"][l, 0])
            z = jax.nn.sigmoid(mm(x_t, params["w_ih"][l, 1]) + params["b_ih"][l, 1]
                               + mm(h, params["w_hh"][l, 1]) + params["b_hh"][l, 1])
            n = jnp.tanh(mm(x_t, params["w_ih"][l, 2]) + params["b_ih"][l, 2]
                         + r * (mm(h, params["w_hh"][l, 2]) + params["b_hh"][l, 2]))
            h = (1.0 - z) * n + z * h
            outs.append(h)
        seq = jnp.stack(outs, axis=1)
        new_hidden.append(h)

    up = mm(seq.reshape(B * T, D), params["w_up"]) + params["b_up"][0]
    out = up.reshape(B, T, frame_size, D).reshape(B, T * frame_size, D)
    return out, jnp.stack(new_hidden, axis=0)


# ----------------------------------------------------------------------------
# Synthetic parameters with the module's shapes
# ----------------------------------------------------------------------------
def make_params(key, frame_size, n_frame_samples, n_rnn, dim):
    ks = jax.random.split(key, 8)
    u = lambda k, shape, a: jax.random.uniform(k, shape, jnp.float32, -a, a)

    # Conv1d(in=n_frame_samples, out=dim, k=1): stored as (S, dim)
    w_exp = u(ks[0], (n_frame_samples, dim), (6.0 / n_frame_samples) ** 0.5)
    b_exp = u(ks[1], (1, dim), 0.05)

    # GRU: per-gate (r,z,n) weights, transposed for x @ W -> (n_rnn, 3, dim, dim)
    w_ih = u(ks[2], (n_rnn, 3, dim, dim), (3.0 / dim) ** 0.5)
    w_hh = u(ks[3], (n_rnn, 3, dim, dim), (3.0 / dim) ** 0.5)
    b_ih = u(ks[4], (n_rnn, 3, 1, dim), 0.05)
    b_hh = u(ks[5], (n_rnn, 3, 1, dim), 0.05)

    # LearnedUpsampling1d: conv_t weight (dim_in, dim_out, frame_size), bias (dim_out, frame_size)
    w_up_raw = u(ks[6], (dim, dim, frame_size), (6.0 / dim) ** 0.5)
    b_up_raw = u(ks[7], (dim, frame_size), 0.05)
    # out[..., k*dim + c_out] = sum_cin x[..., cin] * W[cin, c_out, k] + b[c_out, k]
    w_up = jnp.transpose(w_up_raw, (0, 2, 1)).reshape(dim, frame_size * dim)
    b_up = jnp.transpose(b_up_raw, (1, 0)).reshape(1, frame_size * dim)

    h0 = u(jax.random.fold_in(key, 123), (n_rnn, dim), 0.1)

    return dict(h0=h0, w_exp=w_exp, b_exp=b_exp,
                w_ih=w_ih, b_ih=b_ih, w_hh=w_hh, b_hh=b_hh,
                w_up=w_up, b_up=b_up)


if __name__ == "__main__":
    frame_size = 4
    n_frame_samples = 16
    n_rnn = 2
    dim = 32
    batch = 2
    seq_len = 8

    key = jax.random.PRNGKey(0)
    k_p, k_x, k_c = jax.random.split(key, 3)
    params = make_params(k_p, frame_size, n_frame_samples, n_rnn, dim)

    prev_samples = jax.random.normal(k_x, (batch, seq_len, n_frame_samples), jnp.float32)
    upper_tier_conditioning = jax.random.normal(k_c, (batch, seq_len, dim), jnp.float32)
    hidden = None  # exercises the h0-expansion path

    out, hid = frame_level_rnn(prev_samples, upper_tier_conditioning, hidden,
                               params, frame_size)
    out = jax.block_until_ready(out)
    hid = jax.block_until_ready(hid)

    assert out.shape == (batch, seq_len * frame_size, dim)
    assert hid.shape == (n_rnn, batch, dim)

    out_f32 = out.astype(jnp.float32)

    # Tight check vs a reference using the same bf16-matmul precision choice
    # (output tolerance widened slightly for the bf16 output cast).
    ref_out, ref_hid = reference_forward(prev_samples, upper_tier_conditioning,
                                         hidden, params, frame_size,
                                         matmul_dtype=jnp.bfloat16)
    assert jnp.allclose(out_f32, ref_out, rtol=2e-2, atol=2e-2), "output mismatch vs bf16 reference"
    assert jnp.allclose(hid, ref_hid, rtol=1e-2, atol=1e-2), "hidden mismatch vs bf16 reference"

    # Loose sanity check vs the full-f32 PyTorch-semantics reference.
    f32_out, f32_hid = reference_forward(prev_samples, upper_tier_conditioning,
                                         hidden, params, frame_size,
                                         matmul_dtype=jnp.float32)
    assert jnp.allclose(out_f32, f32_out, rtol=1e-1, atol=1e-1), "output drifted from f32 reference"
    assert jnp.allclose(hid, f32_hid, rtol=1e-1, atol=1e-1), "hidden drifted from f32 reference"

    print("KERNEL_OK")
</pallas_src>

<mosaic_0001>
module attributes {stable_mosaic.version = 11 : i64} {
  func.func @gru_kernel(%arg0: i32, %arg1: i32, %arg2: memref<8x2x16xf32, #tpu.memory_space<vmem>>, %arg3: memref<8x2x32xf32, #tpu.memory_space<vmem>>, %arg4: memref<2x2x32xf32, #tpu.memory_space<vmem>>, %arg5: memref<16x32xbf16, #tpu.memory_space<vmem>>, %arg6: memref<1x32xf32, #tpu.memory_space<vmem>>, %arg7: memref<2x32x96xbf16, #tpu.memory_space<vmem>>, %arg8: memref<2x32x96xbf16, #tpu.memory_space<vmem>>, %arg9: memref<2x1x96xf32, #tpu.memory_space<vmem>>, %arg10: memref<2x1x32xf32, #tpu.memory_space<vmem>>, %arg11: memref<8x2x32xbf16, #tpu.memory_space<vmem>>, %arg12: memref<2x2x32xf32, #tpu.memory_space<vmem>>, %arg13: memref<8x2x32xbf16, #tpu.memory_space<vmem>>, %arg14: memref<8x2x96xf32, #tpu.memory_space<vmem>>) attributes {dimension_semantics = [#tpu.dimension_semantics<parallel>, #tpu.dimension_semantics<arbitrary>], iteration_bounds = array<i64: 1, 1>, scalar_prefetch = 0 : i64, scratch_operands = 2 : i64, tpu.core_type = #tpu.core_type<tc>, window_params = [{transform_indices = @transform_0, window_bounds = array<i64: 8, 2, 16>}, {transform_indices = @transform_1, window_bounds = array<i64: 8, 2, 32>}, {transform_indices = @transform_2, window_bounds = array<i64: 2, 2, 32>}, {pipeline_mode = #tpu.pipeline_mode<synchronous>, transform_indices = @transform_3, window_bounds = array<i64: 16, 32>}, {pipeline_mode = #tpu.pipeline_mode<synchronous>, transform_indices = @transform_4, window_bounds = array<i64: 1, 32>}, {pipeline_mode = #tpu.pipeline_mode<synchronous>, transform_indices = @transform_5, window_bounds = array<i64: 2, 32, 96>}, {pipeline_mode = #tpu.pipeline_mode<synchronous>, transform_indices = @transform_6, window_bounds = array<i64: 2, 32, 96>}, {pipeline_mode = #tpu.pipeline_mode<synchronous>, transform_indices = @transform_7, window_bounds = array<i64: 2, 1, 96>}, {pipeline_mode = #tpu.pipeline_mode<synchronous>, transform_indices = @transform_8, window_bounds = array<i64: 2, 1, 32>}, {transform_indices = @transform_9, window_bounds = array<i64: 8, 2, 32>}, {transform_indices = @transform_10, window_bounds = array<i64: 2, 2, 32>}]} {
    %c0_i32 = arith.constant 0 : i32
    %0 = arith.cmpi eq, %arg1, %c0_i32 : i32
    %1 = arith.extui %0 : i1 to i32
    %c0_i32_0 = arith.constant 0 : i32
    %2 = arith.cmpi ne, %1, %c0_i32_0 : i32
    scf.if %2 {
      %c0_68 = arith.constant 0 : index
      %c0_69 = arith.constant 0 : index
      %c0_70 = arith.constant 0 : index
      %60 = vector.load %arg4[%c0_68, %c0_69, %c0_70] : memref<2x2x32xf32, #tpu.memory_space<vmem>>, vector<2x2x32xf32>
      %c0_71 = arith.constant 0 : index
      %c0_72 = arith.constant 0 : index
      %c0_73 = arith.constant 0 : index
      %61 = vector.load %arg12[%c0_71, %c0_72, %c0_73] : memref<2x2x32xf32, #tpu.memory_space<vmem>>, vector<2x2x32xf32>
      tpu.vector_store %arg12[%c0_71, %c0_72, %c0_73], %60 {strides = array<i32>} : memref<2x2x32xf32, #tpu.memory_space<vmem>>, vector<2x2x32xf32>,
    } else {
    }
    %c0 = arith.constant 0 : index
    %c0_1 = arith.constant 0 : index
    %c0_2 = arith.constant 0 : index
    %3 = vector.load %arg2[%c0, %c0_1, %c0_2] : memref<8x2x16xf32, #tpu.memory_space<vmem>>, vector<8x2x16xf32>
    %4 = vector.shape_cast %3 : vector<8x2x16xf32> to vector<16x16xf32>
    %5 = arith.truncf %4 : vector<16x16xf32> to vector<16x16xbf16>
    %c0_3 = arith.constant 0 : index
    %c0_4 = arith.constant 0 : index
    %6 = vector.load %arg5[%c0_3, %c0_4] : memref<16x32xbf16, #tpu.memory_space<vmem>>, vector<16x32xbf16>
    %cst = arith.constant dense<0.000000e+00> : vector<16x32xf32>
    %7 = tpu.matmul %5, %6, %cst {dimension_numbers = #tpu.dot_dimension_numbers<[1], [0], [0], [1], [0, 0, 1, 1], [], []>} : vector<16x16xbf16>, vector<16x32xbf16>, vector<16x32xf32> -> vector<16x32xf32>
    %c0_5 = arith.constant 0 : index
    %c0_6 = arith.constant 0 : index
    %8 = vector.load %arg6[%c0_5, %c0_6] : memref<1x32xf32, #tpu.memory_space<vmem>>, vector<1x32xf32>
    %9 = vector.broadcast %8 : vector<1x32xf32> to vector<16x32xf32>
    %10 = arith.addf %7, %9 : vector<16x32xf32>
    %11 = vector.shape_cast %10 : vector<16x32xf32> to vector<8x2x32xf32>
    %c0_7 = arith.constant 0 : index
    %c0_8 = arith.constant 0 : index
    %c0_9 = arith.constant 0 : index
    %12 = vector.load %arg3[%c0_7, %c0_8, %c0_9] : memref<8x2x32xf32, #tpu.memory_space<vmem>>, vector<8x2x32xf32>
    %13 = arith.addf %11, %12 : vector<8x2x32xf32>
    %14 = arith.truncf %13 : vector<8x2x32xf32> to vector<8x2x32xbf16>
    %c0_10 = arith.constant 0 : index
    %c0_11 = arith.constant 0 : index
    %c0_12 = arith.constant 0 : index
    %15 = vector.load %arg13[%c0_10, %c0_11, %c0_12] : memref<8x2x32xbf16, #tpu.memory_space<vmem>>, vector<8x2x32xbf16>
    tpu.vector_store %arg13[%c0_10, %c0_11, %c0_12], %14 {strides = array<i32>} : memref<8x2x32xbf16, #tpu.memory_space<vmem>>, vector<8x2x32xbf16>,
    %c0_13 = arith.constant 0 : index
    %c0_14 = arith.constant 0 : index
    %c0_15 = arith.constant 0 : index
    %16 = vector.load %arg13[%c0_13, %c0_14, %c0_15] : memref<8x2x32xbf16, #tpu.memory_space<vmem>>, vector<8x2x32xbf16>
    %17 = vector.shape_cast %16 : vector<8x2x32xbf16> to vector<16x32xbf16>
    %c0_16 = arith.constant 0 : index
    %c0_17 = arith.constant 0 : index
    %c0_18 = arith.constant 0 : index
    %18 = vector.load %arg7[%c0_16, %c0_17, %c0_18] : memref<2x32x96xbf16, #tpu.memory_space<vmem>>, vector<1x32x96xbf16>
    %19 = vector.shape_cast %18 : vector<1x32x96xbf16> to vector<32x96xbf16>
    %cst_19 = arith.constant dense<0.000000e+00> : vector<16x96xf32>
    %20 = tpu.matmul %17, %19, %cst_19 {dimension_numbers = #tpu.dot_dimension_numbers<[1], [0], [0], [1], [0, 0, 1, 1], [], []>} : vector<16x32xbf16>, vector<32x96xbf16>, vector<16x96xf32> -> vector<16x96xf32>
    %c0_20 = arith.constant 0 : index
    %c0_21 = arith.constant 0 : index
    %c0_22 = arith.constant 0 : index
    %21 = vector.load %arg9[%c0_20, %c0_21, %c0_22] : memref<2x1x96xf32, #tpu.memory_space<vmem>>, vector<1x1x96xf32>
    %22 = vector.shape_cast %21 : vector<1x1x96xf32> to vector<1x96xf32>
    %23 = vector.broadcast %22 : vector<1x96xf32> to vector<16x96xf32>
    %24 = arith.addf %20, %23 : vector<16x96xf32>
    %25 = vector.shape_cast %24 : vector<16x96xf32> to vector<8x2x96xf32>
    %c0_23 = arith.constant 0 : index
    %c0_24 = arith.constant 0 : index
    %c0_25 = arith.constant 0 : index
    %26 = vector.load %arg14[%c0_23, %c0_24, %c0_25] : memref<8x2x96xf32, #tpu.memory_space<vmem>>, vector<8x2x96xf32>
    tpu.vector_store %arg14[%c0_23, %c0_24, %c0_25], %25 {strides = array<i32>} : memref<8x2x96xf32, #tpu.memory_space<vmem>>, vector<8x2x96xf32>,
    %c0_26 = arith.constant 0 : index
    %c0_27 = arith.constant 0 : index
    %c0_28 = arith.constant 0 : index
    %27 = vector.load %arg8[%c0_26, %c0_27, %c0_28] : memref<2x32x96xbf16, #tpu.memory_space<vmem>>, vector<1x32x96xbf16>
    %28 = vector.shape_cast %27 : vector<1x32x96xbf16> to vector<32x96xbf16>
    %c0_29 = arith.constant 0 : index
    %c0_30 = arith.constant 0 : index
    %c0_31 = arith.constant 0 : index
    %29 = vector.load %arg10[%c0_29, %c0_30, %c0_31] : memref<2x1x32xf32, #tpu.memory_space<vmem>>, vector<1x1x32xf32>
    %30 = vector.shape_cast %29 : vector<1x1x32xf32> to vector<1x32xf32>
    %c0_32 = arith.constant 0 : index
    %c0_33 = arith.constant 0 : index
    %c0_34 = arith.constant 0 : index
    %31 = vector.load %arg12[%c0_32, %c0_33, %c0_34] : memref<2x2x32xf32, #tpu.memory_space<vmem>>, vector<1x2x32xf32>
    %32 = vector.shape_cast %31 : vector<1x2x32xf32> to vector<2x32xf32>
    %c0_i32_35 = arith.constant 0 : i32
    %c8_i32 = arith.constant 8 : i32
    %33 = arith.addi %c0_i32_35, %c8_i32 : i32
    %c1_i32 = arith.constant 1 : i32
    %34 = scf.for %arg15 = %c0_i32_35 to %33 step %c1_i32 iter_args(%arg16 = %32) -> (vector<2x32xf32>)  : i32 {
      %60 = arith.index_cast %arg15 : i32 to index
      %c0_68 = arith.constant 0 : index
      %c0_69 = arith.constant 0 : index
      %61 = vector.load %arg14[%60, %c0_68, %c0_69] : memref<8x2x96xf32, #tpu.memory_space<vmem>>, vector<1x2x96xf32>
      %62 = vector.shape_cast %61 : vector<1x2x96xf32> to vector<2x96xf32>
      %63 = arith.truncf %arg16 : vector<2x32xf32> to vector<2x32xbf16>
      %cst_70 = arith.constant dense<0.000000e+00> : vector<2x96xf32>
      %64 = tpu.matmul %63, %28, %cst_70 {dimension_numbers = #tpu.dot_dimension_numbers<[1], [0], [0], [1], [0, 0, 1, 1], [], []>} : vector<2x32xbf16>, vector<32x96xbf16>, vector<2x96xf32> -> vector<2x96xf32>
      %65 = vector.extract_strided_slice %62 {offsets = [0, 0], sizes = [2, 64], strides = [1, 1]} : vector<2x96xf32> to vector<2x64xf32>
      %66 = vector.extract_strided_slice %64 {offsets = [0, 0], sizes = [2, 64], strides = [1, 1]} : vector<2x96xf32> to vector<2x64xf32>
      %67 = arith.addf %65, %66 : vector<2x64xf32>
      %68 = arith.negf %67 : vector<2x64xf32>
      %69 = math.exp %68 : vector<2x64xf32>
      %cst_71 = arith.constant 1.000000e+00 : f32
      %70 = vector.broadcast %cst_71 : f32 to vector<2x64xf32>
      %71 = arith.addf %70, %69 : vector<2x64xf32>
      %72 = arith.divf %70, %71 : vector<2x64xf32>
      %73 = vector.extract_strided_slice %72 {offsets = [0, 0], sizes = [2, 32], strides = [1, 1]} : vector<2x64xf32> to vector<2x32xf32>
      %74 = vector.extract_strided_slice %72 {offsets = [0, 32], sizes = [2, 32], strides = [1, 1]} : vector<2x64xf32> to vector<2x32xf32>
      %75 = vector.extract_strided_slice %62 {offsets = [0, 64], sizes = [2, 32], strides = [1, 1]} : vector<2x96xf32> to vector<2x32xf32>
      %76 = vector.extract_strided_slice %64 {offsets = [0, 64], sizes = [2, 32], strides = [1, 1]} : vector<2x96xf32> to vector<2x32xf32>
      %77 = vector.broadcast %30 : vector<1x32xf32> to vector<2x32xf32>
      %78 = arith.addf %76, %77 : vector<2x32xf32>
      %79 = arith.mulf %73, %78 : vector<2x32xf32>
      %80 = arith.addf %75, %79 : vector<2x32xf32>
      %81 = math.tanh %80 : vector<2x32xf32>
      %82 = arith.subf %arg16, %81 : vector<2x32xf32>
      %83 = arith.mulf %74, %82 : vector<2x32xf32>
      %84 = arith.addf %81, %83 : vector<2x32xf32>
      %85 = arith.truncf %84 : vector<2x32xf32> to vector<2x32xbf16>
      %86 = arith.index_cast %arg15 : i32 to index
      %c0_72 = arith.constant 0 : index
      %c0_73 = arith.constant 0 : index
      %87 = vector.load %arg13[%86, %c0_72, %c0_73] : memref<8x2x32xbf16, #tpu.memory_space<vmem>>, vector<1x2x32xbf16>
      %88 = vector.shape_cast %87 : vector<1x2x32xbf16> to vector<2x32xbf16>
      %89 = vector.shape_cast %85 : vector<2x32xbf16> to vector<1x2x32xbf16>
      tpu.vector_store %arg13[%86, %c0_72, %c0_73], %89 {strides = array<i32>} : memref<8x2x32xbf16, #tpu.memory_space<vmem>>, vector<1x2x32xbf16>,
      scf.yield %84 : vector<2x32xf32>
    }
    %c8_i32_36 = arith.constant 8 : i32
    %c0_37 = arith.constant 0 : index
    %c0_38 = arith.constant 0 : index
    %c0_39 = arith.constant 0 : index
    %35 = vector.load %arg12[%c0_37, %c0_38, %c0_39] : memref<2x2x32xf32, #tpu.memory_space<vmem>>, vector<1x2x32xf32>
    %36 = vector.shape_cast %35 : vector<1x2x32xf32> to vector<2x32xf32>
    %37 = vector.shape_cast %34 : vector<2x32xf32> to vector<1x2x32xf32>
    tpu.vector_store %arg12[%c0_37, %c0_38, %c0_39], %37 {strides = array<i32>} : memref<2x2x32xf32, #tpu.memory_space<vmem>>, vector<1x2x32xf32>,
    %c0_40 = arith.constant 0 : index
    %c0_41 = arith.constant 0 : index
    %c0_42 = arith.constant 0 : index
    %38 = vector.load %arg13[%c0_40, %c0_41, %c0_42] : memref<8x2x32xbf16, #tpu.memory_space<vmem>>, vector<8x2x32xbf16>
    %39 = vector.shape_cast %38 : vector<8x2x32xbf16> to vector<16x32xbf16>
    %c1 = arith.constant 1 : index
    %c0_43 = arith.constant 0 : index
    %c0_44 = arith.constant 0 : index
    %40 = vector.load %arg7[%c1, %c0_43, %c0_44] : memref<2x32x96xbf16, #tpu.memory_space<vmem>>, vector<1x32x96xbf16>
    %41 = vector.shape_cast %40 : vector<1x32x96xbf16> to vector<32x96xbf16>
    %cst_45 = arith.constant dense<0.000000e+00> : vector<16x96xf32>
    %42 = tpu.matmul %39, %41, %cst_45 {dimension_numbers = #tpu.dot_dimension_numbers<[1], [0], [0], [1], [0, 0, 1, 1], [], []>} : vector<16x32xbf16>, vector<32x96xbf16>, vector<16x96xf32> -> vector<16x96xf32>
    %c1_46 = arith.constant 1 : index
    %c0_47 = arith.constant 0 : index
    %c0_48 = arith.constant 0 : index
    %43 = vector.load %arg9[%c1_46, %c0_47, %c0_48] : memref<2x1x96xf32, #tpu.memory_space<vmem>>, vector<1x1x96xf32>
    %44 = vector.shape_cast %43 : vector<1x1x96xf32> to vector<1x96xf32>
    %45 = vector.broadcast %44 : vector<1x96xf32> to vector<16x96xf32>
    %46 = arith.addf %42, %45 : vector<16x96xf32>
    %47 = vector.shape_cast %46 : vector<16x96xf32> to vector<8x2x96xf32>
    %c0_49 = arith.constant 0 : index
    %c0_50 = arith.constant 0 : index
    %c0_51 = arith.constant 0 : index
    %48 = vector.load %arg14[%c0_49, %c0_50, %c0_51] : memref<8x2x96xf32, #tpu.memory_space<vmem>>, vector<8x2x96xf32>
    tpu.vector_store %arg14[%c0_49, %c0_50, %c0_51], %47 {strides = array<i32>} : memref<8x2x96xf32, #tpu.memory_space<vmem>>, vector<8x2x96xf32>,
    %c1_52 = arith.constant 1 : index
    %c0_53 = arith.constant 0 : index
    %c0_54 = arith.constant 0 : index
    %49 = vector.load %arg8[%c1_52, %c0_53, %c0_54] : memref<2x32x96xbf16, #tpu.memory_space<vmem>>, vector<1x32x96xbf16>
    %50 = vector.shape_cast %49 : vector<1x32x96xbf16> to vector<32x96xbf16>
    %c1_55 = arith.constant 1 : index
    %c0_56 = arith.constant 0 : index
    %c0_57 = arith.constant 0 : index
    %51 = vector.load %arg10[%c1_55, %c0_56, %c0_57] : memref<2x1x32xf32, #tpu.memory_space<vmem>>, vector<1x1x32xf32>
    %52 = vector.shape_cast %51 : vector<1x1x32xf32> to vector<1x32xf32>
    %c1_58 = arith.constant 1 : index
    %c0_59 = arith.constant 0 : index
    %c0_60 = arith.constant 0 : index
    %53 = vector.load %arg12[%c1_58, %c0_59, %c0_60] : memref<2x2x32xf32, #tpu.memory_space<vmem>>, vector<1x2x32xf32>
    %54 = vector.shape_cast %53 : vector<1x2x32xf32> to vector<2x32xf32>
    %c0_i32_61 = arith.constant 0 : i32
    %c8_i32_62 = arith.constant 8 : i32
    %55 = arith.addi %c0_i32_61, %c8_i32_62 : i32
    %c1_i32_63 = arith.constant 1 : i32
    %56 = scf.for %arg15 = %c0_i32_61 to %55 step %c1_i32_63 iter_args(%arg16 = %54) -> (vector<2x32xf32>)  : i32 {
      %60 = arith.index_cast %arg15 : i32 to index
      %c0_68 = arith.constant 0 : index
      %c0_69 = arith.constant 0 : index
      %61 = vector.load %arg14[%60, %c0_68, %c0_69] : memref<8x2x96xf32, #tpu.memory_space<vmem>>, vector<1x2x96xf32>
      %62 = vector.shape_cast %61 : vector<1x2x96xf32> to vector<2x96xf32>
      %63 = arith.truncf %arg16 : vector<2x32xf32> to vector<2x32xbf16>
      %cst_70 = arith.constant dense<0.000000e+00> : vector<2x96xf32>
      %64 = tpu.matmul %63, %50, %cst_70 {dimension_numbers = #tpu.dot_dimension_numbers<[1], [0], [0], [1], [0, 0, 1, 1], [], []>} : vector<2x32xbf16>, vector<32x96xbf16>, vector<2x96xf32> -> vector<2x96xf32>
      %65 = vector.extract_strided_slice %62 {offsets = [0, 0], sizes = [2, 64], strides = [1, 1]} : vector<2x96xf32> to vector<2x64xf32>
      %66 = vector.extract_strided_slice %64 {offsets = [0, 0], sizes = [2, 64], strides = [1, 1]} : vector<2x96xf32> to vector<2x64xf32>
      %67 = arith.addf %65, %66 : vector<2x64xf32>
      %68 = arith.negf %67 : vector<2x64xf32>
      %69 = math.exp %68 : vector<2x64xf32>
      %cst_71 = arith.constant 1.000000e+00 : f32
      %70 = vector.broadcast %cst_71 : f32 to vector<2x64xf32>
      %71 = arith.addf %70, %69 : vector<2x64xf32>
      %72 = arith.divf %70, %71 : vector<2x64xf32>
      %73 = vector.extract_strided_slice %72 {offsets = [0, 0], sizes = [2, 32], strides = [1, 1]} : vector<2x64xf32> to vector<2x32xf32>
      %74 = vector.extract_strided_slice %72 {offsets = [0, 32], sizes = [2, 32], strides = [1, 1]} : vector<2x64xf32> to vector<2x32xf32>
      %75 = vector.extract_strided_slice %62 {offsets = [0, 64], sizes = [2, 32], strides = [1, 1]} : vector<2x96xf32> to vector<2x32xf32>
      %76 = vector.extract_strided_slice %64 {offsets = [0, 64], sizes = [2, 32], strides = [1, 1]} : vector<2x96xf32> to vector<2x32xf32>
      %77 = vector.broadcast %52 : vector<1x32xf32> to vector<2x32xf32>
      %78 = arith.addf %76, %77 : vector<2x32xf32>
      %79 = arith.mulf %73, %78 : vector<2x32xf32>
      %80 = arith.addf %75, %79 : vector<2x32xf32>
      %81 = math.tanh %80 : vector<2x32xf32>
      %82 = arith.subf %arg16, %81 : vector<2x32xf32>
      %83 = arith.mulf %74, %82 : vector<2x32xf32>
      %84 = arith.addf %81, %83 : vector<2x32xf32>
      %85 = arith.truncf %84 : vector<2x32xf32> to vector<2x32xbf16>
      %86 = arith.index_cast %arg15 : i32 to index
      %c0_72 = arith.constant 0 : index
      %c0_73 = arith.constant 0 : index
      %87 = vector.load %arg11[%86, %c0_72, %c0_73] : memref<8x2x32xbf16, #tpu.memory_space<vmem>>, vector<1x2x32xbf16>
      %88 = vector.shape_cast %87 : vector<1x2x32xbf16> to vector<2x32xbf16>
      %89 = vector.shape_cast %85 : vector<2x32xbf16> to vector<1x2x32xbf16>
      tpu.vector_store %arg11[%86, %c0_72, %c0_73], %89 {strides = array<i32>} : memref<8x2x32xbf16, #tpu.memory_space<vmem>>, vector<1x2x32xbf16>,
      scf.yield %84 : vector<2x32xf32>
    }
    %c8_i32_64 = arith.constant 8 : i32
    %c1_65 = arith.constant 1 : index
    %c0_66 = arith.constant 0 : index
    %c0_67 = arith.constant 0 : index
    %57 = vector.load %arg12[%c1_65, %c0_66, %c0_67] : memref<2x2x32xf32, #tpu.memory_space<vmem>>, vector<1x2x32xf32>
    %58 = vector.shape_cast %57 : vector<1x2x32xf32> to vector<2x32xf32>
    %59 = vector.shape_cast %56 : vector<2x32xf32> to vector<1x2x32xf32>
    tpu.vector_store %arg12[%c1_65, %c0_66, %c0_67], %59 {strides = array<i32>} : memref<2x2x32xf32, #tpu.memory_space<vmem>>, vector<1x2x32xf32>,
    return
  }
  func.func @transform_0(%arg0: i32, %arg1: i32) -> (i32, i32, i32) {
    %c0_i32 = arith.constant 0 : i32
    %c0_i32_0 = arith.constant 0 : i32
    return %arg1, %arg0, %c0_i32 : i32, i32, i32
  }
  func.func @transform_1(%arg0: i32, %arg1: i32) -> (i32, i32, i32) {
    %c0_i32 = arith.constant 0 : i32
    %c0_i32_0 = arith.constant 0 : i32
    return %arg1, %arg0, %c0_i32 : i32, i32, i32
  }
  func.func @transform_2(%arg0: i32, %arg1: i32) -> (i32, i32, i32) {
    %c0_i32 = arith.constant 0 : i32
    %c0_i32_0 = arith.constant 0 : i32
    %c0_i32_1 = arith.constant 0 : i32
    return %c0_i32, %arg0, %c0_i32_0 : i32, i32, i32
  }
  func.func @transform_3(%arg0: i32, %arg1: i32) -> (i32, i32) {
    %c0_i32 = arith.constant 0 : i32
    %c0_i32_0 = arith.constant 0 : i32
    %c0_i32_1 = arith.constant 0 : i32
    return %c0_i32, %c0_i32_0 : i32, i32
  }
  func.func @transform_4(%arg0: i32, %arg1: i32) -> (i32, i32) {
    %c0_i32 = arith.constant 0 : i32
    %c0_i32_0 = arith.constant 0 : i32
    %c0_i32_1 = arith.constant 0 : i32
    return %c0_i32, %c0_i32_0 : i32, i32
  }
  func.func @transform_5(%arg0: i32, %arg1: i32) -> (i32, i32, i32) {
    %c0_i32 = arith.constant 0 : i32
    %c0_i32_0 = arith.constant 0 : i32
    %c0_i32_1 = arith.constant 0 : i32
    %c0_i32_2 = arith.constant 0 : i32
    return %c0_i32, %c0_i32_0, %c0_i32_1 : i32, i32, i32
  }
  func.func @transform_6(%arg0: i32, %arg1: i32) -> (i32, i32, i32) {
    %c0_i32 = arith.constant 0 : i32
    %c0_i32_0 = arith.constant 0 : i32
    %c0_i32_1 = arith.constant 0 : i32
    %c0_i32_2 = arith.constant 0 : i32
    return %c0_i32, %c0_i32_0, %c0_i32_1 : i32, i32, i32
  }
  func.func @transform_7(%arg0: i32, %arg1: i32) -> (i32, i32, i32) {
    %c0_i32 = arith.constant 0 : i32
    %c0_i32_0 = arith.constant 0 : i32
    %c0_i32_1 = arith.constant 0 : i32
    %c0_i32_2 = arith.constant 0 : i32
    return %c0_i32, %c0_i32_0, %c0_i32_1 : i32, i32, i32
  }
  func.func @transform_8(%arg0: i32, %arg1: i32) -> (i32, i32, i32) {
    %c0_i32 = arith.constant 0 : i32
    %c0_i32_0 = arith.constant 0 : i32
    %c0_i32_1 = arith.constant 0 : i32
    %c0_i32_2 = arith.constant 0 : i32
    return %c0_i32, %c0_i32_0, %c0_i32_1 : i32, i32, i32
  }
  func.func @transform_9(%arg0: i32, %arg1: i32) -> (i32, i32, i32) {
    %c0_i32 = arith.constant 0 : i32
    %c0_i32_0 = arith.constant 0 : i32
    return %arg1, %arg0, %c0_i32 : i32, i32, i32
  }
  func.func @transform_10(%arg0: i32, %arg1: i32) -> (i32, i32, i32) {
    %c0_i32 = arith.constant 0 : i32
    %c0_i32_0 = arith.constant 0 : i32
    %c0_i32_1 = arith.constant 0 : i32
    return %c0_i32, %arg0, %c0_i32_0 : i32, i32, i32
  }
}

module attributes {stable_mosaic.version = 11 : i64} {
  func.func @gru_kernel(%arg0: i32, %arg1: i32, %arg2: memref<8x2x16xf32, #tpu.memory_space<vmem>>, %arg3: memref<8x2x32xf32, #tpu.memory_space<vmem>>, %arg4: memref<2x2x32xf32, #tpu.memory_space<vmem>>, %arg5: memref<16x32xbf16, #tpu.memory_space<vmem>>, %arg6: memref<1x32xf32, #tpu.memory_space<vmem>>, %arg7: memref<2x32x96xbf16, #tpu.memory_space<vmem>>, %arg8: memref<2x32x96xbf16, #tpu.memory_space<vmem>>, %arg9: memref<2x1x96xf32, #tpu.memory_space<vmem>>, %arg10: memref<2x1x32xf32, #tpu.memory_space<vmem>>, %arg11: memref<8x2x32xbf16, #tpu.memory_space<vmem>>, %arg12: memref<2x2x32xf32, #tpu.memory_space<vmem>>, %arg13: memref<8x2x32xbf16, #tpu.memory_space<vmem>>, %arg14: memref<8x2x96xf32, #tpu.memory_space<vmem>>) attributes {dimension_semantics = [#tpu.dimension_semantics<parallel>, #tpu.dimension_semantics<arbitrary>], iteration_bounds = array<i64: 1, 1>, scalar_prefetch = 0 : i64, scratch_operands = 2 : i64, tpu.core_type = #tpu.core_type<tc>, window_params = [{transform_indices = @transform_0, window_bounds = array<i64: 8, 2, 16>}, {transform_indices = @transform_1, window_bounds = array<i64: 8, 2, 32>}, {transform_indices = @transform_2, window_bounds = array<i64: 2, 2, 32>}, {pipeline_mode = #tpu.pipeline_mode<synchronous>, transform_indices = @transform_3, window_bounds = array<i64: 16, 32>}, {pipeline_mode = #tpu.pipeline_mode<synchronous>, transform_indices = @transform_4, window_bounds = array<i64: 1, 32>}, {pipeline_mode = #tpu.pipeline_mode<synchronous>, transform_indices = @transform_5, window_bounds = array<i64: 2, 32, 96>}, {pipeline_mode = #tpu.pipeline_mode<synchronous>, transform_indices = @transform_6, window_bounds = array<i64: 2, 32, 96>}, {pipeline_mode = #tpu.pipeline_mode<synchronous>, transform_indices = @transform_7, window_bounds = array<i64: 2, 1, 96>}, {pipeline_mode = #tpu.pipeline_mode<synchronous>, transform_indices = @transform_8, window_bounds = array<i64: 2, 1, 32>}, {transform_indices = @transform_9, window_bounds = array<i64: 8, 2, 32>}, {transform_indices = @transform_10, window_bounds = array<i64: 2, 2, 32>}]} {
    %c0_i32 = arith.constant 0 : i32
    %0 = arith.cmpi eq, %arg1, %c0_i32 : i32
    %1 = arith.extui %0 : i1 to i32
    %c0_i32_0 = arith.constant 0 : i32
    %2 = arith.cmpi ne, %1, %c0_i32_0 : i32
    scf.if %2 {
      %c0_68 = arith.constant 0 : index
      %c0_69 = arith.constant 0 : index
      %c0_70 = arith.constant 0 : index
      %60 = vector.load %arg4[%c0_68, %c0_69, %c0_70] : memref<2x2x32xf32, #tpu.memory_space<vmem>>, vector<2x2x32xf32>
      %c0_71 = arith.constant 0 : index
      %c0_72 = arith.constant 0 : index
      %c0_73 = arith.constant 0 : index
      %61 = vector.load %arg12[%c0_71, %c0_72, %c0_73] : memref<2x2x32xf32, #tpu.memory_space<vmem>>, vector<2x2x32xf32>
      tpu.vector_store %arg12[%c0_71, %c0_72, %c0_73], %60 {strides = array<i32>} : memref<2x2x32xf32, #tpu.memory_space<vmem>>, vector<2x2x32xf32>,
    } else {
    }
    %c0 = arith.constant 0 : index
    %c0_1 = arith.constant 0 : index
    %c0_2 = arith.constant 0 : index
    %3 = vector.load %arg2[%c0, %c0_1, %c0_2] : memref<8x2x16xf32, #tpu.memory_space<vmem>>, vector<8x2x16xf32>
    %4 = vector.shape_cast %3 : vector<8x2x16xf32> to vector<16x16xf32>
    %5 = arith.truncf %4 : vector<16x16xf32> to vector<16x16xbf16>
    %c0_3 = arith.constant 0 : index
    %c0_4 = arith.constant 0 : index
    %6 = vector.load %arg5[%c0_3, %c0_4] : memref<16x32xbf16, #tpu.memory_space<vmem>>, vector<16x32xbf16>
    %cst = arith.constant dense<0.000000e+00> : vector<16x32xf32>
    %7 = tpu.matmul %5, %6, %cst {dimension_numbers = #tpu.dot_dimension_numbers<[1], [0], [0], [1], [0, 0, 1, 1], [], []>} : vector<16x16xbf16>, vector<16x32xbf16>, vector<16x32xf32> -> vector<16x32xf32>
    %c0_5 = arith.constant 0 : index
    %c0_6 = arith.constant 0 : index
    %8 = vector.load %arg6[%c0_5, %c0_6] : memref<1x32xf32, #tpu.memory_space<vmem>>, vector<1x32xf32>
    %9 = vector.broadcast %8 : vector<1x32xf32> to vector<16x32xf32>
    %10 = arith.addf %7, %9 : vector<16x32xf32>
    %11 = vector.shape_cast %10 : vector<16x32xf32> to vector<8x2x32xf32>
    %c0_7 = arith.constant 0 : index
    %c0_8 = arith.constant 0 : index
    %c0_9 = arith.constant 0 : index
    %12 = vector.load %arg3[%c0_7, %c0_8, %c0_9] : memref<8x2x32xf32, #tpu.memory_space<vmem>>, vector<8x2x32xf32>
    %13 = arith.addf %11, %12 : vector<8x2x32xf32>
    %14 = arith.truncf %13 : vector<8x2x32xf32> to vector<8x2x32xbf16>
    %c0_10 = arith.constant 0 : index
    %c0_11 = arith.constant 0 : index
    %c0_12 = arith.constant 0 : index
    %15 = vector.load %arg13[%c0_10, %c0_11, %c0_12] : memref<8x2x32xbf16, #tpu.memory_space<vmem>>, vector<8x2x32xbf16>
    tpu.vector_store %arg13[%c0_10, %c0_11, %c0_12], %14 {strides = array<i32>} : memref<8x2x32xbf16, #tpu.memory_space<vmem>>, vector<8x2x32xbf16>,
    %c0_13 = arith.constant 0 : index
    %c0_14 = arith.constant 0 : index
    %c0_15 = arith.constant 0 : index
    %16 = vector.load %arg13[%c0_13, %c0_14, %c0_15] : memref<8x2x32xbf16, #tpu.memory_space<vmem>>, vector<8x2x32xbf16>
    %17 = vector.shape_cast %16 : vector<8x2x32xbf16> to vector<16x32xbf16>
    %c0_16 = arith.constant 0 : index
    %c0_17 = arith.constant 0 : index
    %c0_18 = arith.constant 0 : index
    %18 = vector.load %arg7[%c0_16, %c0_17, %c0_18] : memref<2x32x96xbf16, #tpu.memory_space<vmem>>, vector<1x32x96xbf16>
    %19 = vector.shape_cast %18 : vector<1x32x96xbf16> to vector<32x96xbf16>
    %cst_19 = arith.constant dense<0.000000e+00> : vector<16x96xf32>
    %20 = tpu.matmul %17, %19, %cst_19 {dimension_numbers = #tpu.dot_dimension_numbers<[1], [0], [0], [1], [0, 0, 1, 1], [], []>} : vector<16x32xbf16>, vector<32x96xbf16>, vector<16x96xf32> -> vector<16x96xf32>
    %c0_20 = arith.constant 0 : index
    %c0_21 = arith.constant 0 : index
    %c0_22 = arith.constant 0 : index
    %21 = vector.load %arg9[%c0_20, %c0_21, %c0_22] : memref<2x1x96xf32, #tpu.memory_space<vmem>>, vector<1x1x96xf32>
    %22 = vector.shape_cast %21 : vector<1x1x96xf32> to vector<1x96xf32>
    %23 = vector.broadcast %22 : vector<1x96xf32> to vector<16x96xf32>
    %24 = arith.addf %20, %23 : vector<16x96xf32>
    %25 = vector.shape_cast %24 : vector<16x96xf32> to vector<8x2x96xf32>
    %c0_23 = arith.constant 0 : index
    %c0_24 = arith.constant 0 : index
    %c0_25 = arith.constant 0 : index
    %26 = vector.load %arg14[%c0_23, %c0_24, %c0_25] : memref<8x2x96xf32, #tpu.memory_space<vmem>>, vector<8x2x96xf32>
    tpu.vector_store %arg14[%c0_23, %c0_24, %c0_25], %25 {strides = array<i32>} : memref<8x2x96xf32, #tpu.memory_space<vmem>>, vector<8x2x96xf32>,
    %c0_26 = arith.constant 0 : index
    %c0_27 = arith.constant 0 : index
    %c0_28 = arith.constant 0 : index
    %27 = vector.load %arg8[%c0_26, %c0_27, %c0_28] : memref<2x32x96xbf16, #tpu.memory_space<vmem>>, vector<1x32x96xbf16>
    %28 = vector.shape_cast %27 : vector<1x32x96xbf16> to vector<32x96xbf16>
    %c0_29 = arith.constant 0 : index
    %c0_30 = arith.constant 0 : index
    %c0_31 = arith.constant 0 : index
    %29 = vector.load %arg10[%c0_29, %c0_30, %c0_31] : memref<2x1x32xf32, #tpu.memory_space<vmem>>, vector<1x1x32xf32>
    %30 = vector.shape_cast %29 : vector<1x1x32xf32> to vector<1x32xf32>
    %c0_32 = arith.constant 0 : index
    %c0_33 = arith.constant 0 : index
    %c0_34 = arith.constant 0 : index
    %31 = vector.load %arg12[%c0_32, %c0_33, %c0_34] : memref<2x2x32xf32, #tpu.memory_space<vmem>>, vector<1x2x32xf32>
    %32 = vector.shape_cast %31 : vector<1x2x32xf32> to vector<2x32xf32>
    %c0_i32_35 = arith.constant 0 : i32
    %c8_i32 = arith.constant 8 : i32
    %33 = arith.addi %c0_i32_35, %c8_i32 : i32
    %c1_i32 = arith.constant 1 : i32
    %34 = scf.for %arg15 = %c0_i32_35 to %33 step %c1_i32 iter_args(%arg16 = %32) -> (vector<2x32xf32>)  : i32 {
      %60 = arith.index_cast %arg15 : i32 to index
      %c0_68 = arith.constant 0 : index
      %c0_69 = arith.constant 0 : index
      %61 = vector.load %arg14[%60, %c0_68, %c0_69] : memref<8x2x96xf32, #tpu.memory_space<vmem>>, vector<1x2x96xf32>
      %62 = vector.shape_cast %61 : vector<1x2x96xf32> to vector<2x96xf32>
      %63 = arith.truncf %arg16 : vector<2x32xf32> to vector<2x32xbf16>
      %cst_70 = arith.constant dense<0.000000e+00> : vector<2x96xf32>
      %64 = tpu.matmul %63, %28, %cst_70 {dimension_numbers = #tpu.dot_dimension_numbers<[1], [0], [0], [1], [0, 0, 1, 1], [], []>} : vector<2x32xbf16>, vector<32x96xbf16>, vector<2x96xf32> -> vector<2x96xf32>
      %65 = vector.extract_strided_slice %62 {offsets = [0, 0], sizes = [2, 64], strides = [1, 1]} : vector<2x96xf32> to vector<2x64xf32>
      %66 = vector.extract_strided_slice %64 {offsets = [0, 0], sizes = [2, 64], strides = [1, 1]} : vector<2x96xf32> to vector<2x64xf32>
      %67 = arith.addf %65, %66 : vector<2x64xf32>
      %68 = arith.negf %67 : vector<2x64xf32>
      %69 = math.exp %68 : vector<2x64xf32>
      %cst_71 = arith.constant 1.000000e+00 : f32
      %70 = vector.broadcast %cst_71 : f32 to vector<2x64xf32>
      %71 = arith.addf %70, %69 : vector<2x64xf32>
      %72 = arith.divf %70, %71 : vector<2x64xf32>
      %73 = vector.extract_strided_slice %72 {offsets = [0, 0], sizes = [2, 32], strides = [1, 1]} : vector<2x64xf32> to vector<2x32xf32>
      %74 = vector.extract_strided_slice %72 {offsets = [0, 32], sizes = [2, 32], strides = [1, 1]} : vector<2x64xf32> to vector<2x32xf32>
      %75 = vector.extract_strided_slice %62 {offsets = [0, 64], sizes = [2, 32], strides = [1, 1]} : vector<2x96xf32> to vector<2x32xf32>
      %76 = vector.extract_strided_slice %64 {offsets = [0, 64], sizes = [2, 32], strides = [1, 1]} : vector<2x96xf32> to vector<2x32xf32>
      %77 = vector.broadcast %30 : vector<1x32xf32> to vector<2x32xf32>
      %78 = arith.addf %76, %77 : vector<2x32xf32>
      %79 = arith.mulf %73, %78 : vector<2x32xf32>
      %80 = arith.addf %75, %79 : vector<2x32xf32>
      %81 = math.tanh %80 : vector<2x32xf32>
      %82 = arith.subf %arg16, %81 : vector<2x32xf32>
      %83 = arith.mulf %74, %82 : vector<2x32xf32>
      %84 = arith.addf %81, %83 : vector<2x32xf32>
      %85 = arith.truncf %84 : vector<2x32xf32> to vector<2x32xbf16>
      %86 = arith.index_cast %arg15 : i32 to index
      %c0_72 = arith.constant 0 : index
      %c0_73 = arith.constant 0 : index
      %87 = vector.load %arg13[%86, %c0_72, %c0_73] : memref<8x2x32xbf16, #tpu.memory_space<vmem>>, vector<1x2x32xbf16>
      %88 = vector.shape_cast %87 : vector<1x2x32xbf16> to vector<2x32xbf16>
      %89 = vector.shape_cast %85 : vector<2x32xbf16> to vector<1x2x32xbf16>
      tpu.vector_store %arg13[%86, %c0_72, %c0_73], %89 {strides = array<i32>} : memref<8x2x32xbf16, #tpu.memory_space<vmem>>, vector<1x2x32xbf16>,
      scf.yield %84 : vector<2x32xf32>
    }
    %c8_i32_36 = arith.constant 8 : i32
    %c0_37 = arith.constant 0 : index
    %c0_38 = arith.constant 0 : index
    %c0_39 = arith.constant 0 : index
    %35 = vector.load %arg12[%c0_37, %c0_38, %c0_39] : memref<2x2x32xf32, #tpu.memory_space<vmem>>, vector<1x2x32xf32>
    %36 = vector.shape_cast %35 : vector<1x2x32xf32> to vector<2x32xf32>
    %37 = vector.shape_cast %34 : vector<2x32xf32> to vector<1x2x32xf32>
    tpu.vector_store %arg12[%c0_37, %c0_38, %c0_39], %37 {strides = array<i32>} : memref<2x2x32xf32, #tpu.memory_space<vmem>>, vector<1x2x32xf32>,
    %c0_40 = arith.constant 0 : index
    %c0_41 = arith.constant 0 : index
    %c0_42 = arith.constant 0 : index
    %38 = vector.load %arg13[%c0_40, %c0_41, %c0_42] : memref<8x2x32xbf16, #tpu.memory_space<vmem>>, vector<8x2x32xbf16>
    %39 = vector.shape_cast %38 : vector<8x2x32xbf16> to vector<16x32xbf16>
    %c1 = arith.constant 1 : index
    %c0_43 = arith.constant 0 : index
    %c0_44 = arith.constant 0 : index
    %40 = vector.load %arg7[%c1, %c0_43, %c0_44] : memref<2x32x96xbf16, #tpu.memory_space<vmem>>, vector<1x32x96xbf16>
    %41 = vector.shape_cast %40 : vector<1x32x96xbf16> to vector<32x96xbf16>
    %cst_45 = arith.constant dense<0.000000e+00> : vector<16x96xf32>
    %42 = tpu.matmul %39, %41, %cst_45 {dimension_numbers = #tpu.dot_dimension_numbers<[1], [0], [0], [1], [0, 0, 1, 1], [], []>} : vector<16x32xbf16>, vector<32x96xbf16>, vector<16x96xf32> -> vector<16x96xf32>
    %c1_46 = arith.constant 1 : index
    %c0_47 = arith.constant 0 : index
    %c0_48 = arith.constant 0 : index
    %43 = vector.load %arg9[%c1_46, %c0_47, %c0_48] : memref<2x1x96xf32, #tpu.memory_space<vmem>>, vector<1x1x96xf32>
    %44 = vector.shape_cast %43 : vector<1x1x96xf32> to vector<1x96xf32>
    %45 = vector.broadcast %44 : vector<1x96xf32> to vector<16x96xf32>
    %46 = arith.addf %42, %45 : vector<16x96xf32>
    %47 = vector.shape_cast %46 : vector<16x96xf32> to vector<8x2x96xf32>
    %c0_49 = arith.constant 0 : index
    %c0_50 = arith.constant 0 : index
    %c0_51 = arith.constant 0 : index
    %48 = vector.load %arg14[%c0_49, %c0_50, %c0_51] : memref<8x2x96xf32, #tpu.memory_space<vmem>>, vector<8x2x96xf32>
    tpu.vector_store %arg14[%c0_49, %c0_50, %c0_51], %47 {strides = array<i32>} : memref<8x2x96xf32, #tpu.memory_space<vmem>>, vector<8x2x96xf32>,
    %c1_52 = arith.constant 1 : index
    %c0_53 = arith.constant 0 : index
    %c0_54 = arith.constant 0 : index
    %49 = vector.load %arg8[%c1_52, %c0_53, %c0_54] : memref<2x32x96xbf16, #tpu.memory_space<vmem>>, vector<1x32x96xbf16>
    %50 = vector.shape_cast %49 : vector<1x32x96xbf16> to vector<32x96xbf16>
    %c1_55 = arith.constant 1 : index
    %c0_56 = arith.constant 0 : index
    %c0_57 = arith.constant 0 : index
    %51 = vector.load %arg10[%c1_55, %c0_56, %c0_57] : memref<2x1x32xf32, #tpu.memory_space<vmem>>, vector<1x1x32xf32>
    %52 = vector.shape_cast %51 : vector<1x1x32xf32> to vector<1x32xf32>
    %c1_58 = arith.constant 1 : index
    %c0_59 = arith.constant 0 : index
    %c0_60 = arith.constant 0 : index
    %53 = vector.load %arg12[%c1_58, %c0_59, %c0_60] : memref<2x2x32xf32, #tpu.memory_space<vmem>>, vector<1x2x32xf32>
    %54 = vector.shape_cast %53 : vector<1x2x32xf32> to vector<2x32xf32>
    %c0_i32_61 = arith.constant 0 : i32
    %c8_i32_62 = arith.constant 8 : i32
    %55 = arith.addi %c0_i32_61, %c8_i32_62 : i32
    %c1_i32_63 = arith.constant 1 : i32
    %56 = scf.for %arg15 = %c0_i32_61 to %55 step %c1_i32_63 iter_args(%arg16 = %54) -> (vector<2x32xf32>)  : i32 {
      %60 = arith.index_cast %arg15 : i32 to index
      %c0_68 = arith.constant 0 : index
      %c0_69 = arith.constant 0 : index
      %61 = vector.load %arg14[%60, %c0_68, %c0_69] : memref<8x2x96xf32, #tpu.memory_space<vmem>>, vector<1x2x96xf32>
      %62 = vector.shape_cast %61 : vector<1x2x96xf32> to vector<2x96xf32>
      %63 = arith.truncf %arg16 : vector<2x32xf32> to vector<2x32xbf16>
      %cst_70 = arith.constant dense<0.000000e+00> : vector<2x96xf32>
      %64 = tpu.matmul %63, %50, %cst_70 {dimension_numbers = #tpu.dot_dimension_numbers<[1], [0], [0], [1], [0, 0, 1, 1], [], []>} : vector<2x32xbf16>, vector<32x96xbf16>, vector<2x96xf32> -> vector<2x96xf32>
      %65 = vector.extract_strided_slice %62 {offsets = [0, 0], sizes = [2, 64], strides = [1, 1]} : vector<2x96xf32> to vector<2x64xf32>
      %66 = vector.extract_strided_slice %64 {offsets = [0, 0], sizes = [2, 64], strides = [1, 1]} : vector<2x96xf32> to vector<2x64xf32>
      %67 = arith.addf %65, %66 : vector<2x64xf32>
      %68 = arith.negf %67 : vector<2x64xf32>
      %69 = math.exp %68 : vector<2x64xf32>
      %cst_71 = arith.constant 1.000000e+00 : f32
      %70 = vector.broadcast %cst_71 : f32 to vector<2x64xf32>
      %71 = arith.addf %70, %69 : vector<2x64xf32>
      %72 = arith.divf %70, %71 : vector<2x64xf32>
      %73 = vector.extract_strided_slice %72 {offsets = [0, 0], sizes = [2, 32], strides = [1, 1]} : vector<2x64xf32> to vector<2x32xf32>
      %74 = vector.extract_strided_slice %72 {offsets = [0, 32], sizes = [2, 32], strides = [1, 1]} : vector<2x64xf32> to vector<2x32xf32>
      %75 = vector.extract_strided_slice %62 {offsets = [0, 64], sizes = [2, 32], strides = [1, 1]} : vector<2x96xf32> to vector<2x32xf32>
      %76 = vector.extract_strided_slice %64 {offsets = [0, 64], sizes = [2, 32], strides = [1, 1]} : vector<2x96xf32> to vector<2x32xf32>
      %77 = vector.broadcast %52 : vector<1x32xf32> to vector<2x32xf32>
      %78 = arith.addf %76, %77 : vector<2x32xf32>
      %79 = arith.mulf %73, %78 : vector<2x32xf32>
      %80 = arith.addf %75, %79 : vector<2x32xf32>
      %81 = math.tanh %80 : vector<2x32xf32>
      %82 = arith.subf %arg16, %81 : vector<2x32xf32>
      %83 = arith.mulf %74, %82 : vector<2x32xf32>
      %84 = arith.addf %81, %83 : vector<2x32xf32>
      %85 = arith.truncf %84 : vector<2x32xf32> to vector<2x32xbf16>
      %86 = arith.index_cast %arg15 : i32 to index
      %c0_72 = arith.constant 0 : index
      %c0_73 = arith.constant 0 : index
      %87 = vector.load %arg11[%86, %c0_72, %c0_73] : memref<8x2x32xbf16, #tpu.memory_space<vmem>>, vector<1x2x32xbf16>
      %88 = vector.shape_cast %87 : vector<1x2x32xbf16> to vector<2x32xbf16>
      %89 = vector.shape_cast %85 : vector<2x32xbf16> to vector<1x2x32xbf16>
      tpu.vector_store %arg11[%86, %c0_72, %c0_73], %89 {strides = array<i32>} : memref<8x2x32xbf16, #tpu.memory_space<vmem>>, vector<1x2x32xbf16>,
      scf.yield %84 : vector<2x32xf32>
    }
    %c8_i32_64 = arith.constant 8 : i32
    %c1_65 = arith.constant 1 : index
    %c0_66 = arith.constant 0 : index
    %c0_67 = arith.constant 0 : index
    %57 = vector.load %arg12[%c1_65, %c0_66, %c0_67] : memref<2x2x32xf32, #tpu.memory_space<vmem>>, vector<1x2x32xf32>
    %58 = vector.shape_cast %57 : vector<1x2x32xf32> to vector<2x32xf32>
    %59 = vector.shape_cast %56 : vector<2x32xf32> to vector<1x2x32xf32>
    tpu.vector_store %arg12[%c1_65, %c0_66, %c0_67], %59 {strides = array<i32>} : memref<2x2x32xf32, #tpu.memory_space<vmem>>, vector<1x2x32xf32>,
    return
  }
  func.func @transform_0(%arg0: i32, %arg1: i32) -> (i32, i32, i32) {
    %c0_i32 = arith.constant 0 : i32
    %c0_i32_0 = arith.constant 0 : i32
    return %arg1, %arg0, %c0_i32 : i32, i32, i32
  }
  func.func @transform_1(%arg0: i32, %arg1: i32) -> (i32, i32, i32) {
    %c0_i32 = arith.constant 0 : i32
    %c0_i32_0 = arith.constant 0 : i32
    return %arg1, %arg0, %c0_i32 : i32, i32, i32
  }
  func.func @transform_2(%arg0: i32, %arg1: i32) -> (i32, i32, i32) {
    %c0_i32 = arith.constant 0 : i32
    %c0_i32_0 = arith.constant 0 : i32
    %c0_i32_1 = arith.constant 0 : i32
    return %c0_i32, %arg0, %c0_i32_0 : i32, i32, i32
  }
  func.func @transform_3(%arg0: i32, %arg1: i32) -> (i32, i32) {
    %c0_i32 = arith.constant 0 : i32
    %c0_i32_0 = arith.constant 0 : i32
    %c0_i32_1 = arith.constant 0 : i32
    return %c0_i32, %c0_i32_0 : i32, i32
  }
  func.func @transform_4(%arg0: i32, %arg1: i32) -> (i32, i32) {
    %c0_i32 = arith.constant 0 : i32
    %c0_i32_0 = arith.constant 0 : i32
    %c0_i32_1 = arith.constant 0 : i32
    return %c0_i32, %c0_i32_0 : i32, i32
  }
  func.func @transform_5(%arg0: i32, %arg1: i32) -> (i32, i32, i32) {
    %c0_i32 = arith.constant 0 : i32
    %c0_i32_0 = arith.constant 0 : i32
    %c0_i32_1 = arith.constant 0 : i32
    %c0_i32_2 = arith.constant 0 : i32
    return %c0_i32, %c0_i32_0, %c0_i32_1 : i32, i32, i32
  }
  func.func @transform_6(%arg0: i32, %arg1: i32) -> (i32, i32, i32) {
    %c0_i32 = arith.constant 0 : i32
    %c0_i32_0 = arith.constant 0 : i32
    %c0_i32_1 = arith.constant 0 : i32
    %c0_i32_2 = arith.constant 0 : i32
    return %c0_i32, %c0_i32_0, %c0_i32_1 : i32, i32, i32
  }
  func.func @transform_7(%arg0: i32, %arg1: i32) -> (i32, i32, i32) {
    %c0_i32 = arith.constant 0 : i32
    %c0_i32_0 = arith.constant 0 : i32
    %c0_i32_1 = arith.constant 0 : i32
    %c0_i32_2 = arith.constant 0 : i32
    return %c0_i32, %c0_i32_0, %c0_i32_1 : i32, i32, i32
  }
  func.func @transform_8(%arg0: i32, %arg1: i32) -> (i32, i32, i32) {
    %c0_i32 = arith.constant 0 : i32
    %c0_i32_0 = arith.constant 0 : i32
    %c0_i32_1 = arith.constant 0 : i32
    %c0_i32_2 = arith.constant 0 : i32
    return %c0_i32, %c0_i32_0, %c0_i32_1 : i32, i32, i32
  }
  func.func @transform_9(%arg0: i32, %arg1: i32) -> (i32, i32, i32) {
    %c0_i32 = arith.constant 0 : i32
    %c0_i32_0 = arith.constant 0 : i32
    return %arg1, %arg0, %c0_i32 : i32, i32, i32
  }
  func.func @transform_10(%arg0: i32, %arg1: i32) -> (i32, i32, i32) {
    %c0_i32 = arith.constant 0 : i32
    %c0_i32_0 = arith.constant 0 : i32
    %c0_i32_1 = arith.constant 0 : i32
    return %c0_i32, %arg0, %c0_i32_0 : i32, i32, i32
  }
}

</mosaic_0001>

<bundles_post_ra>
// kernel: tpu_custom_call.1
= control target key start
LH: loop header
LB: loop body
LE: loop exit
PB: predicated region body
PF: predicated region fallthrough
CT: control target
= control target key end

     0   :  { %16 = vsyncpa [#allocation5], 0  ;;  %s1373_s0 = inlined_call_operand.hbm [shape: f32[8,2,16], index: 0, kind: input, shape index: {}]   ;;  %s1374_s1 = inlined_call_operand.hbm [shape: f32[8,2,32], index: 1, kind: input, shape index: {}]   ;;  %s1375_s2 = inlined_call_operand.hbm [shape: f32[2,2,32], index: 2, kind: input, shape index: {}]   ;;  %s1376_s3 = inlined_call_operand.hbm [shape: bf16[16,32], index: 3, kind: input, shape index: {}]   ;;  %s1377_s4 = inlined_call_operand.hbm [shape: f32[1,32], index: 4, kind: input, shape index: {}]   ;;  %s1378_s5 = inlined_call_operand.hbm [shape: bf16[2,32,96], index: 5, kind: input, shape index: {}]   ;;  %s1379_s6 = inlined_call_operand.hbm [shape: bf16[2,32,96], index: 6, kind: input, shape index: {}]   ;;  %s1380_s7 = inlined_call_operand.vmem [shape: f32[2,1,96], index: 7, kind: input, shape index: {}]   ;;  %s1381_s8 = inlined_call_operand.vmem [shape: f32[2,1,32], index: 8, kind: input, shape index: {}]   ;;  %s1382_s9 = inlined_call_operand.hbm [shape: bf16[8,2,32], index: 9, kind: output, shape index: {0}]   ;;  %s1383_s10 = inlined_call_operand.hbm [shape: f32[2,2,32], index: 10, kind: output, shape index: {1}]  }
   0x1   :  { %17 = vsyncpa [#allocation8], 0 }
   0x2   :  { %18 = vsyncpa [#allocation11], 0 }
   0x3   :  { %19 = vsyncpa [#allocation14], 0 }
   0x4   :  { %20 = vsyncpa [#allocation6], 0 }
   0x5   :  { %21 = vsyncpa [#allocation18], 0  ;;  %s39_s15 = sshll.u32 %s1374_s1, 4  ;;  %s1128_s16 = smov [#allocation7]   ;;  %s40_s15 = int_to_ptr.hbm [resolvable:$true] %s39_s15 }
   0x6   :  { %s41_s17 = sshll.u32 %s1128_s16, 4  ;;  %s65_s20 = sshll.u32 %s1376_s3, 4  ;;  %s42_s17 = int_to_ptr.vmem [resolvable:$true] %s41_s17  ;;  %s66_s20 = int_to_ptr.hbm [resolvable:$true] %s65_s20 }
   0x7   :  { %s1129_s21 = smov 32   ;;  %s1130_s22 = smov 2  }
   0x8   :  { %47 = dma.hbm_to_vmem [thread:$0]  %s40_s15, 256, %s42_s17, [#allocation8], %s1129_s21, %s1129_s21, %s1130_s22  }
   0x9   :  { %s1131_s23 = smov [#allocation10]   ;;  %s1132_s25 = smov 64  }
   0xa   :  { %s67_s24 = sshll.u32 %s1131_s23, 4  ;;  %s1133_s1 = smov 4   ;;  %s68_s24 = int_to_ptr.vmem [resolvable:$true] %s67_s24 }
   0xb   :  { %73 = dma.hbm_to_vmem [thread:$0]  %s66_s20, 128, %s68_s24, [#allocation11], %s1132_s25, %s1132_s25, %s1133_s1  }
   0xc   :  { %s89_s3 = sshll.u32 %s1378_s5, 4  ;;  %s1134_s28 = smov [#allocation13]   ;;  %s90_s3 = int_to_ptr.hbm [resolvable:$true] %s89_s3 }
   0xd   :  { %s91_s29 = sshll.u32 %s1134_s28, 4  ;;  %s26_s12 = sshll.u32 %s1373_s0, 4  ;;  %s92_s29 = int_to_ptr.vmem [resolvable:$true] %s91_s29  ;;  %s27_s12 = int_to_ptr.hbm [resolvable:$true] %s26_s12 }
   0xe   :  { %97 = dma.hbm_to_vmem [thread:$0]  %s90_s3, 512, %s92_s29, [#allocation14], %s1132_s25, %s1132_s25, %s1133_s1  }
   0xf   :  { %s1135_s13 = smov [#allocation4]   ;;  %s52_s17 = sshll.u32 %s1375_s2, 4  ;;  %s53_s17 = int_to_ptr.hbm [resolvable:$true] %s52_s17 }
  0x10   :  { %s28_s14 = sshll.u32 %s1135_s13, 4  ;;  %s79_s0 = sshll.u32 %s1377_s4, 4  ;;  %s29_s14 = int_to_ptr.vmem [resolvable:$true] %s28_s14  ;;  %s80_s0 = int_to_ptr.hbm [resolvable:$true] %s79_s0 }
  0x11   :  { %34 = dma.hbm_to_vmem [thread:$0]  %s27_s12, 256, %s29_s14, [#allocation5], %s1129_s21, %s1129_s21, %s1130_s22  }
  0x12   :  { %s1136_s19 = smov [#allocation9]   ;;  %s1137_s23 = smov [#allocation12]  }
  0x13   :  { %s54_s20 = sshll.u32 %s1136_s19, 4  ;;  %s81_s2 = sshll.u32 %s1137_s23, 4  ;;  %s55_s20 = int_to_ptr.vmem [resolvable:$true] %s54_s20  ;;  %s82_s2 = int_to_ptr.vmem [resolvable:$true] %s81_s2 }
  0x14   :  { %60 = dma.hbm_to_vmem [thread:$0]  %s53_s17, 64, %s55_s20, [#allocation8], %s1129_s21, %s1129_s21, %s1130_s22  }
  0x15   :  { %s102_s27 = sshll.u32 %s1379_s6, 4  ;;  %s1138_s3 = smov [#allocation15]   ;;  %s103_s27 = int_to_ptr.hbm [resolvable:$true] %s102_s27 }
  0x16   :  { %84 = dma.hbm_to_vmem [thread:$0]  %s80_s0, 16, %s82_s2, [#allocation11]  }
  0x17   :  { %s104_s28 = sshll.u32 %s1138_s3, 4  ;;  %s105_s28 = int_to_ptr.vmem [resolvable:$true] %s104_s28 }
  0x18   :  { %110 = dma.hbm_to_vmem [thread:$0]  %s103_s27, 512, %s105_s28, [#allocation14], %s1132_s25, %s1132_s25, %s1133_s1  }
  0x19   :  { %1100 = dma.done.wait [#allocation5], 256  }
  0x1a   :  { %1101 = vsyncadd [#allocation5], 4294967040 }
  0x1b   :  { %1102 = dma.done.wait [#allocation8], 320  }
  0x1c   :  { %1103 = vsyncadd [#allocation8], 4294966976 }
  0x1d   :  { %1104 = dma.done.wait [#allocation11], 144  }
  0x1e   :  { %1105 = vsyncadd [#allocation11], 4294967152 }
  0x1f   :  { %1106 = dma.done.wait [#allocation14], 1024  }
  0x20   :  { %1107 = vsyncadd [#allocation14], 4294966272  ;;  %vm150_vm0 = vcmask 254976   ;;  %v148_v0 = vld [vmem:[#allocation9] sm:$0x3]  ;;  %v793_v7 = vld [vmem:[#allocation10] sm:$0xff] }
  0x21   :  { %v149_v1 = vld [vmem:[#allocation9 + $0x2] sm:$0x3]  ;;  %v1241_v2 = vld [vmem:[#allocation15] sm:$0xf]  ;;  %151 = vst.msk [vmem:[#allocation17] sm:$0x3] %vm150_vm0, %v148_v0  ;;  %212 = vmatpush.bf16.msra.mxu0 %v793_v7 }
  0x22   :  { %v1244_v3 = vld [vmem:[#allocation15] sm:$0xf0]  ;;  %v1246_v4 = vld [vmem:[#allocation15 + $0x8] sm:$0xf]  ;;  %152 = vst.msk [vmem:[#allocation17 + $0x2] sm:$0x3] %vm150_vm0, %v149_v1 }
  0x23   :  { %v1249_v5 = vld [vmem:[#allocation15 + $0x8] sm:$0xf0]  ;;  %v1254_v6 = vld [vmem:[%s1381_s8] sm:$0x1]  ;;  %v154_v9 = vld [vmem:[#allocation4 + $0x2] sm:$0x3] }
  0x24   :  { %v153_v8 = vld [vmem:[#allocation4] sm:$0x3]  ;;  %v155_v10 = vld [vmem:[#allocation4 + $0x4] sm:$0x3]  ;;  %v156_v11 = vld [vmem:[#allocation4 + $0x6] sm:$0x3] }
  0x25   :  { %169 = vst [vmem:[#allocation1] ss:$4 sm:$0xff] %v153_v8  ;;  %v157_v12 = vld [vmem:[#allocation4 + $0x8] sm:$0x3]  ;;  %v158_v14 = vld [vmem:[#allocation4 + $0xa] sm:$0x3] }
  0x26   :  { %171 = vst [vmem:[#allocation1 + $0x1] ss:$4 sm:$0xff] %v154_v9  ;;  %v159_v15 = vld [vmem:[#allocation4 + $0xc] sm:$0x3]  ;;  %v160_v16 = vld [vmem:[#allocation4 + $0xe] sm:$0x3] }
  0x27   :  { %173 = vst [vmem:[#allocation1 + $0x2] ss:$4 sm:$0xff] %v155_v10  ;;  %vm201_vm1 = vcmask 130048   ;;  %v853_v20 = vld [vmem:[#allocation12] ss:$0 sm:$0xff]  ;;  %v795_v21 = vld [vmem:[#allocation13 + $0x8] sm:$0xff] }
  0x28   :  { %v1256_v13 = vld [vmem:[#allocation17] sm:$0x3]   ;;  %175 = vst [vmem:[#allocation1 + $0x3] ss:$4 sm:$0xff] %v156_v11  ;;  %327 = vmatpush.bf16.msra.mxu1 %v795_v21  ;;  %v794_v22 = vld [vmem:[#allocation13] sm:$0xff]  ;;  %vm257_vm2 = vcmask 253952  }
  0x29   :  { %177 = vst [vmem:[#allocation1 + $0x20] ss:$4 sm:$0xff] %v157_v12  ;;  %v233_v24 = vld [vmem:[#allocation7] sm:$0x3]  ;;  %v234_v26 = vld [vmem:[#allocation7 + $0x2] sm:$0x3] }
  0x2a   :  { %179 = vst [vmem:[#allocation1 + $0x21] ss:$4 sm:$0xff] %v158_v14  ;;  %v235_v27 = vld [vmem:[#allocation7 + $0x4] sm:$0x3]  ;;  %v236_v28 = vld [vmem:[#allocation7 + $0x6] sm:$0x3] }
  0x2b   :  { %181 = vst [vmem:[#allocation1 + $0x22] ss:$4 sm:$0xff] %v159_v15  ;;  %v237_v41 = vld [vmem:[#allocation7 + $0x8] sm:$0x3]  ;;  %v238_v43 = vld [vmem:[#allocation7 + $0xa] sm:$0x3] }
  0x2c   :  { %183 = vst [vmem:[#allocation1 + $0x23] ss:$4 sm:$0xff] %v160_v16  ;;  %328 = vmatpush.bf16.msra.mxu1 %v794_v22  ;;  %v239_v44 = vld [vmem:[#allocation7 + $0xc] sm:$0x3]  ;;  %v240_v45 = vld [vmem:[#allocation7 + $0xe] sm:$0x3] }
  0x2d   :  { %vm318_vm3 = vcmask 261120   ;;  %v854_v7 = vld [vmem:[%s1380_s7] ss:$0 sm:$0xff]  ;;  %vm349_vm4 = vcmask 779264   ;;  %s1281_s29 = smov 0  }
  0x2f   :  { %v184_v17 = vld.sshfl [vmem:[#allocation1] sm:$0xff pattern:$0x73625140] }
  0x33   :  { %v185_v18 = vld.sshfl [vmem:[#allocation1 + $0x20] sm:$0xff pattern:$0x73625140] }
  0x34   :  { %v188_v19 = vpack.c.bf16 %v185_v18, %v184_v17 }
  0x36   :  { %750 = vmatmul.msk.bf16.vlgmr.msra.gmra.mxu0 %vm201_vm1, %v188_v19 }
  0xb3   :  { %v214_v23 = vpop.f32.mrf.mxu0 }
  0xb4   :  { %v215_v25 = vadd.f32 %v853_v20, %v214_v23 }
  0xb6   :  { %v221_v29 = vrot.slane %v215_v25, 2  ;;  %v222_v30 = vrot.slane %v215_v25, 4  ;;  %v223_v31 = vrot.slane %v215_v25, 6  ;;  %v241_v32 = vadd.f32 %v233_v24, %v215_v25 }
  0xb8   :  { %v242_v33 = vadd.f32 %v234_v26, %v221_v29  ;;  %v243_v34 = vadd.f32 %v235_v27, %v222_v30  ;;  %v244_v35 = vadd.f32 %v236_v28, %v223_v31  ;;  %v249_v36 = vpack.c.bf16 %v241_v32, %v241_v32 }
  0xba   :  { %v250_v37 = vpack.c.bf16 %v242_v33, %v242_v33  ;;  %v251_v38 = vpack.c.bf16 %v243_v34, %v243_v34  ;;  %v252_v39 = vpack.c.bf16 %v244_v35, %v244_v35  ;;  %258 = vst.msk [vmem:[#allocation2] sm:$0x1] %vm257_vm2, %v249_v36 }
  0xbb   :  { %v216_v40 = vpop.f32.mrf.mxu0 }
  0xbc   :  { %259 = vst.msk [vmem:[#allocation2 + $0x1] sm:$0x1] %vm257_vm2, %v250_v37  ;;  %v217_v42 = vadd.f32 %v853_v20, %v216_v40 }
  0xbd   :  { %260 = vst.msk [vmem:[#allocation2 + $0x2] sm:$0x1] %vm257_vm2, %v251_v38 }
  0xbe   :  { %261 = vst.msk [vmem:[#allocation2 + $0x3] sm:$0x1] %vm257_vm2, %v252_v39  ;;  %v224_v46 = vrot.slane %v217_v42, 2  ;;  %v225_v47 = vrot.slane %v217_v42, 4  ;;  %v226_v48 = vrot.slane %v217_v42, 6  ;;  %v245_v49 = vadd.f32 %v237_v41, %v217_v42 }
  0xc0   :  { %v246_v50 = vadd.f32 %v238_v43, %v224_v46  ;;  %v247_v51 = vadd.f32 %v239_v44, %v225_v47  ;;  %v253_v52 = vpack.c.bf16 %v245_v49, %v245_v49  ;;  %v248_v54 = vadd.f32 %v240_v45, %v226_v48 }
  0xc1   :  { %v266_v53 = vld [vmem:[#allocation2] sm:$0x1] }
  0xc2   :  { %283 = vst [vmem:[#allocation1] ss:$9 sm:$0xff] %v266_v53  ;;  %v254_v56 = vpack.c.bf16 %v246_v50, %v246_v50  ;;  %v255_v58 = vpack.c.bf16 %v247_v51, %v247_v51  ;;  %v256_v60 = vpack.c.bf16 %v248_v54, %v248_v54 }
  0xc3   :  { %v267_v55 = vld [vmem:[#allocation2 + $0x1] sm:$0x1]  ;;  %262 = vst.msk [vmem:[#allocation2 + $0x4] sm:$0x1] %vm257_vm2, %v253_v52 }
  0xc4   :  { %v268_v57 = vld [vmem:[#allocation2 + $0x2] sm:$0x1]  ;;  %286 = vst [vmem:[#allocation1 + $0x1] ss:$9 sm:$0xff] %v267_v55 }
  0xc5   :  { %v269_v59 = vld [vmem:[#allocation2 + $0x3] sm:$0x1]  ;;  %289 = vst [vmem:[#allocation1 + $0x2] ss:$9 sm:$0xff] %v268_v57 }
  0xc6   :  { %292 = vst [vmem:[#allocation1 + $0x3] ss:$9 sm:$0xff] %v269_v59 }
  0xc7   :  { %263 = vst.msk [vmem:[#allocation2 + $0x5] sm:$0x1] %vm257_vm2, %v254_v56 }
  0xc8   :  { %264 = vst.msk [vmem:[#allocation2 + $0x6] sm:$0x1] %vm257_vm2, %v255_v58 }
  0xc9   :  { %265 = vst.msk [vmem:[#allocation2 + $0x7] sm:$0x1] %vm257_vm2, %v256_v60 }
  0xca   :  { %v270_v61 = vld [vmem:[#allocation2 + $0x4] sm:$0x1] }
  0xcb   :  { %295 = vst [vmem:[#allocation1 + $0x4] ss:$9 sm:$0xff] %v270_v61 }
  0xce   :  { %v271_v62 = vld [vmem:[#allocation2 + $0x5] sm:$0x1] }
  0xcf   :  { %v272_v63 = vld [vmem:[#allocation2 + $0x6] sm:$0x1]  ;;  %298 = vst [vmem:[#allocation1 + $0x5] ss:$9 sm:$0xff] %v271_v62 }
  0xd0   :  { %v273_v0 = vld [vmem:[#allocation2 + $0x7] sm:$0x1]  ;;  %301 = vst [vmem:[#allocation1 + $0x6] ss:$9 sm:$0xff] %v272_v63 }
  0xd1   :  { %304 = vst [vmem:[#allocation1 + $0x7] ss:$9 sm:$0xff] %v273_v0 }
  0xd8   :  { %v305_v1 = vld [vmem:[#allocation1] sm:$0xff] }
  0xd9   :  { %759 = vmatmul.msk.bf16.vlgmr.msra.gmra.mxu1 %vm318_vm3, %v305_v1 }
 0x156   :  { %v330_v8 = vpop.f32.mrf.mxu1 }
 0x157   :  { %v331_v9 = vadd.f32 %v854_v7, %v330_v8 }
 0x159   :  { %v337_v10 = vrot.slane %v331_v9, 2  ;;  %v338_v11 = vrot.slane %v331_v9, 4  ;;  %v339_v12 = vrot.slane %v331_v9, 6  ;;  %350 = vst.msk [vmem:[#allocation3] sm:$0x3] %vm349_vm4, %v331_v9 }
 0x15b   :  { %351 = vst.msk [vmem:[#allocation3 + $0x2] sm:$0x3] %vm349_vm4, %v337_v10 }
 0x15c   :  { %352 = vst.msk [vmem:[#allocation3 + $0x4] sm:$0x3] %vm349_vm4, %v338_v11 }
 0x15d   :  { %353 = vst.msk [vmem:[#allocation3 + $0x6] sm:$0x3] %vm349_vm4, %v339_v12 }
 0x15e   :  { %v332_v14 = vpop.f32.mrf.mxu1 }
 0x15f   :  { %v333_v15 = vadd.f32 %v854_v7, %v332_v14 }
 0x161   :  { %v340_v16 = vrot.slane %v333_v15, 2  ;;  %v341_v17 = vrot.slane %v333_v15, 4  ;;  %v342_v18 = vrot.slane %v333_v15, 6  ;;  %354 = vst.msk [vmem:[#allocation3 + $0x8] sm:$0x3] %vm349_vm4, %v333_v15 }
 0x163   :  { %355 = vst.msk [vmem:[#allocation3 + $0xa] sm:$0x3] %vm349_vm4, %v340_v16 }
 0x164   :  { %356 = vst.msk [vmem:[#allocation3 + $0xc] sm:$0x3] %vm349_vm4, %v341_v17 }
 0x165   :  { %357 = vst.msk [vmem:[#allocation3 + $0xe] sm:$0x3] %vm349_vm4, %v342_v18 }
 0x166 LB: > { %v768_v19 = vor.u32 %v1249_v5, %v1246_v4  ;;  %v424_v20 = vperm.slane %v1254_v6, 0  ;;  %v764_v21 = vor.u32 %v1244_v3, %v1241_v2  ;;  %s1139_s30 = smov 64   ;;  %v374_v22 = vpack.c.bf16 %v1114_v13, %v1114_v13  ;;  %s760_s11 = sshll.u32 %s1118_s29, 1  ;;  %s1118_s29 = sphi %s1281_s29, %s369_s29   ;;  %v1114_v13 = vphi %v1256_v13, %v1384_v13  }
 0x167   : > { %s372_s12 = scalar_lea.vmem [#allocation3], %s760_s11  ;;  %s1140_s13 = smov 32   ;;  %vm458_vm9 = vcmask 1040384  }
 0x168   : > { %396 = vmatpush.bf16.msra.mxu0 %v768_v19  ;;  %425 = vrot.lane.b32.xlu0 %v424_v20, %s1139_s30  ;;  %s466_s14 = scalar_lea.vmem [#allocation2], %s1118_s29  ;;  %s369_s29 = sadd.s32 1, %s1118_s29  }
 0x169   : > { %p366_p0 = scmp.ge.s32.totalorder %s369_s29, 8  }
 0x16a   :  { %v798_v60 = vld [vmem:[#allocation13 + $0x10] sm:$0xff] (%p366_p0)  ;;  %v1314_v5 = vld [vmem:[#allocation15 + $0x18] sm:$0xf] (%p366_p0)  ;;  %v1316_v6 = vld [vmem:[#allocation15 + $0x18] sm:$0xf0] (%p366_p0) }
 0x16b   :  { %v1310_v3 = vld [vmem:[#allocation15 + $0x10] sm:$0xf] (%p366_p0)  ;;  %v1312_v4 = vld [vmem:[#allocation15 + $0x10] sm:$0xf0] (%p366_p0)  ;;  %v574_v9 = vld [vmem:[#allocation17 + $0x2] sm:$0x3] (%p366_p0)  }
 0x16c   : > { %397 = vmatpush.bf16.msra.mxu0 %v764_v21  ;;  %v373_v27 = vld [vmem:[%s372_s12] sm:$0x3] }
 0x16d   :  { %v1321_v8 = vld [vmem:[%s1381_s8 + $0x1] sm:$0x1] (%p366_p0) }
 0x16e   :  { %v861_v10 = vld [vmem:[%s1380_s7 + $0x1] ss:$0 sm:$0xff] (%p366_p0)  ;;  %s1336_s7 = smov (%p366_p0), 0  }
 0x16f   : > { %769 = vmatmul.msk.bf16.vlgmr.msra.gmra.mxu0 %vm318_vm3, %v374_v22 }
 0x1da   : > { %v426_v23 = vpop.permute.xlu0 %425 }
 0x1ec   : > { %v399_v24 = vpop.f32.mrf.mxu0 }
 0x1ed   : > { %v428_v25 = vadd.f32 %v426_v23, %v399_v24  ;;  %v403_v28 = vadd.f32 %v399_v24, %v373_v27 }
 0x1ef   : > { %430 = vrot.lane.b32.xlu0 %v428_v25, %s1139_s30  ;;  %v770_v29 = vmul.f32 -1.442695, %v403_v28 }
 0x1f1   : > { %855 = vpow2.f32 %v770_v29 }
 0x1f4   : > { %v401_v26 = vpop.f32.mrf.mxu0 }
 0x1f7   : > { %v856_v30 = vpop.eup %855 }
 0x1f8   : > { %v407_v31 = vadd.f32 1.0, %v856_v30 }
 0x1fa   : > { %857 = vrcp.f32 %v407_v31  ;;  %v419_v37 = vand.u32 2147483648, %v407_v31  ;;  %vm413_vm6 = vweird.f32 %v407_v31  ;;  %v417_v38 = vand.u32 2147483647, %v407_v31 }
 0x1fc   : > { %v420_v40 = vor.u32 1.1754944e-38, %v419_v37  ;;  %vm418_vm8 = vcmp.eq.f32.partialorder %v417_v38, 8.507059e+37 }
 0x200   : > { %v858_v32 = vpop.eup %857 }
 0x201   : > { %v409_v33 = vmul.f32 %v858_v32, %v407_v31  ;;  %vm414_vm5 = vweird.f32 %v858_v32 }
 0x202   : > { %vm415_vm7 = vmor %vm413_vm6, %vm414_vm5 }
 0x203   : > { %v410_v34 = vsub.f32 1.0, %v409_v33 }
 0x205   : > { %v411_v35 = vmul.f32 %v858_v32, %v410_v34 }
 0x207   : > { %v412_v36 = vadd.f32 %v858_v32, %v411_v35 }
 0x209   : > { %v416_v39 = vsel %vm415_vm7, %v858_v32, %v412_v36 }
 0x20a   : > { %v421_v42 = vsel %vm418_vm8, %v420_v40, %v416_v39 }
 0x261   : > { %v431_v41 = vpop.permute.xlu0 %430 }
 0x262   : > { %v433_v43 = vmul.f32 %v431_v41, %v421_v42 }
 0x264   : > { %435 = vrot.lane.b32.xlu1 %v433_v43, %s1139_s30 }
 0x2d6   : > { %v436_v44 = vpop.permute.xlu1 %435 }
 0x2d7   : > { %v438_v45 = vadd.f32 %v436_v44, %v373_v27 }
 0x2d9   : > { %859 = vtanh.f32 %v438_v45 }
 0x2df   : > { %v860_v46 = vpop.eup %859 }
 0x2e0   : > { %441 = vrot.lane.b32.xlu1 %v860_v46, %s1139_s30 }
 0x352   : > { %v442_v47 = vpop.permute.xlu1 %441 }
 0x353   : > { %v444_v48 = vsub.f32 %v1114_v13, %v442_v47 }
 0x355   : > { %446 = vrot.lane.b32.xlu2 %v444_v48, %s1140_s13 }
 0x3af   : > { %v447_v49 = vpop.permute.xlu2 %446 }
 0x3b0   : > { %v449_v50 = vmul.f32 %v447_v49, %v421_v42 }
 0x3b2   : > { %451 = vrot.lane.b32.xlu2 %v449_v50, %s1140_s13 }
 0x40c   : > { %v452_v51 = vpop.permute.xlu2 %451 }
 0x40d   : > { %v454_v52 = vadd.f32 %v860_v46, %v452_v51 }
 0x40f   : > { %v455_v53 = vpack.c.bf16 %v454_v52, %v454_v52  ;;  %469 = vrot.lane.b32.xlu1 %v454_v52, %s1139_s30 }
 0x411   : > { %v457_v54 = vrot.slane %v455_v53, 3 }
 0x413   : > { %v461_v55 = vsel %vm458_vm9, %v455_v53, %v457_v54 }
 0x414   : > { %463 = vrot.lane.b32.xlu0 %v461_v55, %s1139_s30 }
 0x481   : > { %v470_v56 = vpop.permute.xlu1 %469  }
 0x482   : > { %v1384_v13 = vmov %v470_v56  ;;  %473 = vst.msk [vmem:[#allocation17] sm:$0x3] (%p366_p0), %vm150_vm0, %v470_v56 }
 0x483   :  { %368 = sbr.rel (!%p366_p0) target bundleno = 358 (0x166), region = 140  ;;  %v799_v13 = vld [vmem:[#allocation13 + $0x18] sm:$0xff] (%p366_p0) }
 0x484   :  { %536 = vmatpush.bf16.msra.mxu0 (%p366_p0), %v799_v13 }
 0x486   : > { %v464_v57 = vpop.permute.xlu0 %463 }
 0x487   : > { %467 = vst.msk [vmem:[%s466_s14] sm:$0x1] %vm257_vm2, %v464_v57 }
 0x488   :  { %537 = vmatpush.bf16.msra.mxu0 %v798_v60 }
 0x48e   :  { %v474_v58 = vld [vmem:[#allocation2] sm:$0x1]  ;;  %v475_v59 = vld [vmem:[#allocation2 + $0x1] sm:$0x1]  ;;  %v476_v61 = vld [vmem:[#allocation2 + $0x2] sm:$0x1] }
 0x48f   :  { %v477_v62 = vld [vmem:[#allocation2 + $0x3] sm:$0x1]  ;;  %493 = vst [vmem:[#allocation1] ss:$9 sm:$0xff] %v474_v58  ;;  %v478_v63 = vld [vmem:[#allocation2 + $0x4] sm:$0x1] }
 0x490   :  { %496 = vst [vmem:[#allocation1 + $0x1] ss:$9 sm:$0xff] %v475_v59  ;;  %v479_v0 = vld [vmem:[#allocation2 + $0x5] sm:$0x1]  ;;  %v480_v1 = vld [vmem:[#allocation2 + $0x6] sm:$0x1] }
 0x491   :  { %499 = vst [vmem:[#allocation1 + $0x2] ss:$9 sm:$0xff] %v476_v61  ;;  %v481_v7 = vld [vmem:[#allocation2 + $0x7] sm:$0x1] }
 0x492   :  { %502 = vst [vmem:[#allocation1 + $0x3] ss:$9 sm:$0xff] %v477_v62 }
 0x493   :  { %505 = vst [vmem:[#allocation1 + $0x4] ss:$9 sm:$0xff] %v478_v63 }
 0x494   :  { %508 = vst [vmem:[#allocation1 + $0x5] ss:$9 sm:$0xff] %v479_v0 }
 0x495   :  { %511 = vst [vmem:[#allocation1 + $0x6] ss:$9 sm:$0xff] %v480_v1 }
 0x496   :  { %514 = vst [vmem:[#allocation1 + $0x7] ss:$9 sm:$0xff] %v481_v7 }
 0x49d   :  { %v515_v2 = vld [vmem:[#allocation1] sm:$0xff] }
 0x49e   :  { %780 = vmatmul.msk.bf16.vlgmr.msra.gmra.mxu0 %vm318_vm3, %v515_v2 }
 0x51b   :  { %v539_v11 = vpop.f32.mrf.mxu0 }
 0x51c   :  { %v540_v12 = vadd.f32 %v861_v10, %v539_v11 }
 0x51e   :  { %v546_v14 = vrot.slane %v540_v12, 2  ;;  %v547_v15 = vrot.slane %v540_v12, 4  ;;  %v548_v16 = vrot.slane %v540_v12, 6  ;;  %558 = vst.msk [vmem:[#allocation3] sm:$0x3] %vm349_vm4, %v540_v12 }
 0x520   :  { %559 = vst.msk [vmem:[#allocation3 + $0x2] sm:$0x3] %vm349_vm4, %v546_v14 }
 0x521   :  { %560 = vst.msk [vmem:[#allocation3 + $0x4] sm:$0x3] %vm349_vm4, %v547_v15 }
 0x522   :  { %561 = vst.msk [vmem:[#allocation3 + $0x6] sm:$0x3] %vm349_vm4, %v548_v16 }
 0x523   :  { %v541_v17 = vpop.f32.mrf.mxu0 }
 0x524   :  { %v542_v18 = vadd.f32 %v861_v10, %v541_v17 }
 0x526   :  { %v549_v19 = vrot.slane %v542_v18, 2  ;;  %v550_v20 = vrot.slane %v542_v18, 4  ;;  %v551_v21 = vrot.slane %v542_v18, 6  ;;  %562 = vst.msk [vmem:[#allocation3 + $0x8] sm:$0x3] %vm349_vm4, %v542_v18 }
 0x528   :  { %563 = vst.msk [vmem:[#allocation3 + $0xa] sm:$0x3] %vm349_vm4, %v549_v19 }
 0x529   :  { %564 = vst.msk [vmem:[#allocation3 + $0xc] sm:$0x3] %vm349_vm4, %v550_v20 }
 0x52a   :  { %565 = vst.msk [vmem:[#allocation3 + $0xe] sm:$0x3] %vm349_vm4, %v551_v21 }
 0x52b LB: > { %v790_v22 = vor.u32 %v1316_v6, %v1314_v5  ;;  %v635_v23 = vperm.slane %v1321_v8, 0  ;;  %v786_v24 = vor.u32 %v1312_v4, %v1310_v3  ;;  %s1141_s8 = smov 64   ;;  %v585_v25 = vpack.c.bf16 %v1122_v9, %v1122_v9  ;;  %s782_s18 = sshll.u32 %s1126_s7, 1  ;;  %s1126_s7 = sphi %s1336_s7, %s580_s7   ;;  %v1122_v9 = vphi %v574_v9, %v1385_v9  }
 0x52c   : > { %s583_s0 = scalar_lea.vmem [#allocation3], %s782_s18  ;;  %s1142_s19 = smov 32  }
 0x52d   : > { %607 = vmatpush.bf16.msra.mxu0 %v790_v22  ;;  %636 = vrot.lane.b32.xlu0 %v635_v23, %s1141_s8  ;;  %s677_s20 = scalar_lea.vmem [#allocation16], %s1126_s7  ;;  %s580_s7 = sadd.s32 1, %s1126_s7  }
 0x52e   : > { %p577_p1 = scmp.ge.s32.totalorder %s580_s7, 8  }
 0x52f   :  { %s690_s24 = sshll.u32 (%p577_p1), %s1382_s9, 4  ;;  %s1143_s26 = smov (%p577_p1), [#allocation16]   ;;  %s691_s24 = int_to_ptr.hbm [resolvable:$true] %s690_s24 }
 0x530   :  { %s688_s27 = sshll.u32 (%p577_p1), %s1143_s26, 4  ;;  %s1144_s3 = smov (%p577_p1), 16   ;;  %s689_s27 = int_to_ptr.vmem [resolvable:$true] %s688_s27 }
 0x531   : > { %608 = vmatpush.bf16.msra.mxu0 %v786_v24  ;;  %v584_v30 = vld [vmem:[%s583_s0] sm:$0x3]  ;;  %s1145_s28 = smov (%p577_p1), 1   ;;  %s1146_s4 = smov (%p577_p1), [#allocation17]  }
 0x532   :  { %s701_s6 = sshll.u32 (%p577_p1), %s1146_s4, 4  ;;  %s703_s29 = sshll.u32 (%p577_p1), %s1383_s10, 4  ;;  %s702_s6 = int_to_ptr.vmem [resolvable:$true] %s701_s6  ;;  %s704_s29 = int_to_ptr.hbm [resolvable:$true] %s703_s29 }
 0x534   : > { %791 = vmatmul.msk.bf16.vlgmr.msra.gmra.mxu0 %vm318_vm3, %v585_v25 }
 0x59f   : > { %v637_v26 = vpop.permute.xlu0 %636 }
 0x5b1   : > { %v610_v27 = vpop.f32.mrf.mxu0 }
 0x5b2   : > { %v639_v28 = vadd.f32 %v637_v26, %v610_v27  ;;  %v614_v31 = vadd.f32 %v610_v27, %v584_v30 }
 0x5b4   : > { %641 = vrot.lane.b32.xlu0 %v639_v28, %s1141_s8  ;;  %v792_v32 = vmul.f32 -1.442695, %v614_v31 }
 0x5b6   : > { %862 = vpow2.f32 %v792_v32 }
 0x5b9   : > { %v612_v29 = vpop.f32.mrf.mxu0 }
 0x5bc   : > { %v863_v33 = vpop.eup %862 }
 0x5bd   : > { %v618_v34 = vadd.f32 1.0, %v863_v33 }
 0x5bf   : > { %864 = vrcp.f32 %v618_v34  ;;  %v630_v40 = vand.u32 2147483648, %v618_v34  ;;  %vm624_vm11 = vweird.f32 %v618_v34  ;;  %v628_v41 = vand.u32 2147483647, %v618_v34 }
 0x5c1   : > { %v631_v43 = vor.u32 1.1754944e-38, %v630_v40  ;;  %vm629_vm13 = vcmp.eq.f32.partialorder %v628_v41, 8.507059e+37 }
 0x5c5   : > { %v865_v35 = vpop.eup %864 }
 0x5c6   : > { %v620_v36 = vmul.f32 %v865_v35, %v618_v34  ;;  %vm625_vm10 = vweird.f32 %v865_v35 }
 0x5c7   : > { %vm626_vm12 = vmor %vm624_vm11, %vm625_vm10 }
 0x5c8   : > { %v621_v37 = vsub.f32 1.0, %v620_v36 }
 0x5ca   : > { %v622_v38 = vmul.f32 %v865_v35, %v621_v37 }
 0x5cc   : > { %v623_v39 = vadd.f32 %v865_v35, %v622_v38 }
 0x5ce   : > { %v627_v42 = vsel %vm626_vm12, %v865_v35, %v623_v39 }
 0x5cf   : > { %v632_v45 = vsel %vm629_vm13, %v631_v43, %v627_v42 }
 0x626   : > { %v642_v44 = vpop.permute.xlu0 %641 }
 0x627   : > { %v644_v46 = vmul.f32 %v642_v44, %v632_v45 }
 0x629   : > { %646 = vrot.lane.b32.xlu1 %v644_v46, %s1141_s8 }
 0x69b   : > { %v647_v47 = vpop.permute.xlu1 %646 }
 0x69c   : > { %v649_v48 = vadd.f32 %v647_v47, %v584_v30 }
 0x69e   : > { %866 = vtanh.f32 %v649_v48 }
 0x6a4   : > { %v867_v49 = vpop.eup %866 }
 0x6a5   : > { %652 = vrot.lane.b32.xlu1 %v867_v49, %s1141_s8 }
 0x717   : > { %v653_v50 = vpop.permute.xlu1 %652 }
 0x718   : > { %v655_v51 = vsub.f32 %v1122_v9, %v653_v50 }
 0x71a   : > { %657 = vrot.lane.b32.xlu2 %v655_v51, %s1142_s19 }
 0x774   : > { %v658_v52 = vpop.permute.xlu2 %657 }
 0x775   : > { %v660_v53 = vmul.f32 %v658_v52, %v632_v45 }
 0x777   : > { %662 = vrot.lane.b32.xlu2 %v660_v53, %s1142_s19 }
 0x7d1   : > { %v663_v54 = vpop.permute.xlu2 %662 }
 0x7d2   : > { %v665_v55 = vadd.f32 %v867_v49, %v663_v54 }
 0x7d4   : > { %v666_v56 = vpack.c.bf16 %v665_v55, %v665_v55  ;;  %680 = vrot.lane.b32.xlu1 %v665_v55, %s1141_s8 }
 0x7d6   : > { %v668_v57 = vrot.slane %v666_v56, 3 }
 0x7d8   : > { %v672_v13 = vsel %vm458_vm9, %v666_v56, %v668_v57 }
 0x7d9   : > { %674 = vrot.lane.b32.xlu0 %v672_v13, %s1141_s8 }
 0x846   : > { %v681_v58 = vpop.permute.xlu1 %680  }
 0x847   : > { %v1385_v9 = vmov %v681_v58  ;;  %683 = vst.msk [vmem:[#allocation17 + $0x2] sm:$0x3] (%p577_p1), %vm150_vm0, %v681_v58 }
 0x848   :  { %579 = sbr.rel (!%p577_p1) target bundleno = 1323 (0x52b), region = 151 }
 0x849   :  { %709 = dma.vmem_to_hbm [thread:$0]  (%p577_p1), %s702_s6, 64, %s704_s29, [#allocation18], %s1129_s21, %s1129_s21, %s1130_s22  }
 0x84b   : > { %v675_v59 = vpop.permute.xlu0 %674 }
 0x84c   : > { %678 = vst.msk [vmem:[%s677_s20] sm:$0x1] %vm257_vm2, %v675_v59 }
 0x84d   :  { %696 = dma.vmem_to_hbm [thread:$0]  %s689_s27, 128, %s691_s24, [#allocation6], %s1144_s3, %s1144_s3, %s1145_s28  }
 0x84e   :  { %1108 = dma.done.wait [#allocation6], 128  }
 0x84f   :  { %1109 = vsyncadd [#allocation6], 4294967168 }
 0x850   :  { %1110 = dma.done.wait [#allocation18], 64  }
 0x851   :  { %1111 = vsyncadd [#allocation18], 4294967232 }
 0x852   :  { %718 = vsyncpa [#allocation5], 1 }
 0x853   :  { %719 = vsyncpa [#allocation8], 1 }
 0x854   :  { %720 = vsyncpa [#allocation11], 1 }
 0x855   :  { %721 = vsyncpa [#allocation14], 1 }
 0x856   :  { %722 = vsyncpa [#allocation6], 1 }
 0x857   :  { %723 = vsyncpa [#allocation18], 1 }

// kernel: tpu_custom_call.1
= control target key start
LH: loop header
LB: loop body
LE: loop exit
PB: predicated region body
PF: predicated region fallthrough
CT: control target
= control target key end

     0   :  { %16 = vsyncpa [#allocation5], 0  ;;  %s1373_s0 = inlined_call_operand.hbm [shape: f32[8,2,16], index: 0, kind: input, shape index: {}]   ;;  %s1374_s1 = inlined_call_operand.hbm [shape: f32[8,2,32], index: 1, kind: input, shape index: {}]   ;;  %s1375_s2 = inlined_call_operand.hbm [shape: f32[2,2,32], index: 2, kind: input, shape index: {}]   ;;  %s1376_s3 = inlined_call_operand.hbm [shape: bf16[16,32], index: 3, kind: input, shape index: {}]   ;;  %s1377_s4 = inlined_call_operand.hbm [shape: f32[1,32], index: 4, kind: input, shape index: {}]   ;;  %s1378_s5 = inlined_call_operand.hbm [shape: bf16[2,32,96], index: 5, kind: input, shape index: {}]   ;;  %s1379_s6 = inlined_call_operand.hbm [shape: bf16[2,32,96], index: 6, kind: input, shape index: {}]   ;;  %s1380_s7 = inlined_call_operand.vmem [shape: f32[2,1,96], index: 7, kind: input, shape index: {}]   ;;  %s1381_s8 = inlined_call_operand.vmem [shape: f32[2,1,32], index: 8, kind: input, shape index: {}]   ;;  %s1382_s9 = inlined_call_operand.hbm [shape: bf16[8,2,32], index: 9, kind: output, shape index: {0}]   ;;  %s1383_s10 = inlined_call_operand.hbm [shape: f32[2,2,32], index: 10, kind: output, shape index: {1}]  }
   0x1   :  { %17 = vsyncpa [#allocation8], 0 }
   0x2   :  { %18 = vsyncpa [#allocation11], 0 }
   0x3   :  { %19 = vsyncpa [#allocation14], 0 }
   0x4   :  { %20 = vsyncpa [#allocation6], 0 }
   0x5   :  { %21 = vsyncpa [#allocation18], 0  ;;  %s39_s15 = sshll.u32 %s1374_s1, 4  ;;  %s1128_s16 = smov [#allocation7]   ;;  %s40_s15 = int_to_ptr.hbm [resolvable:$true] %s39_s15 }
   0x6   :  { %s41_s17 = sshll.u32 %s1128_s16, 4  ;;  %s65_s20 = sshll.u32 %s1376_s3, 4  ;;  %s42_s17 = int_to_ptr.vmem [resolvable:$true] %s41_s17  ;;  %s66_s20 = int_to_ptr.hbm [resolvable:$true] %s65_s20 }
   0x7   :  { %s1129_s21 = smov 32   ;;  %s1130_s22 = smov 2  }
   0x8   :  { %47 = dma.hbm_to_vmem [thread:$0]  %s40_s15, 256, %s42_s17, [#allocation8], %s1129_s21, %s1129_s21, %s1130_s22  }
   0x9   :  { %s1131_s23 = smov [#allocation10]   ;;  %s1132_s25 = smov 64  }
   0xa   :  { %s67_s24 = sshll.u32 %s1131_s23, 4  ;;  %s1133_s1 = smov 4   ;;  %s68_s24 = int_to_ptr.vmem [resolvable:$true] %s67_s24 }
   0xb   :  { %73 = dma.hbm_to_vmem [thread:$0]  %s66_s20, 128, %s68_s24, [#allocation11], %s1132_s25, %s1132_s25, %s1133_s1  }
   0xc   :  { %s89_s3 = sshll.u32 %s1378_s5, 4  ;;  %s1134_s28 = smov [#allocation13]   ;;  %s90_s3 = int_to_ptr.hbm [resolvable:$true] %s89_s3 }
   0xd   :  { %s91_s29 = sshll.u32 %s1134_s28, 4  ;;  %s26_s12 = sshll.u32 %s1373_s0, 4  ;;  %s92_s29 = int_to_ptr.vmem [resolvable:$true] %s91_s29  ;;  %s27_s12 = int_to_ptr.hbm [resolvable:$true] %s26_s12 }
   0xe   :  { %97 = dma.hbm_to_vmem [thread:$0]  %s90_s3, 512, %s92_s29, [#allocation14], %s1132_s25, %s1132_s25, %s1133_s1  }
   0xf   :  { %s1135_s13 = smov [#allocation4]   ;;  %s52_s17 = sshll.u32 %s1375_s2, 4  ;;  %s53_s17 = int_to_ptr.hbm [resolvable:$true] %s52_s17 }
  0x10   :  { %s28_s14 = sshll.u32 %s1135_s13, 4  ;;  %s79_s0 = sshll.u32 %s1377_s4, 4  ;;  %s29_s14 = int_to_ptr.vmem [resolvable:$true] %s28_s14  ;;  %s80_s0 = int_to_ptr.hbm [resolvable:$true] %s79_s0 }
  0x11   :  { %34 = dma.hbm_to_vmem [thread:$0]  %s27_s12, 256, %s29_s14, [#allocation5], %s1129_s21, %s1129_s21, %s1130_s22  }
  0x12   :  { %s1136_s19 = smov [#allocation9]   ;;  %s1137_s23 = smov [#allocation12]  }
  0x13   :  { %s54_s20 = sshll.u32 %s1136_s19, 4  ;;  %s81_s2 = sshll.u32 %s1137_s23, 4  ;;  %s55_s20 = int_to_ptr.vmem [resolvable:$true] %s54_s20  ;;  %s82_s2 = int_to_ptr.vmem [resolvable:$true] %s81_s2 }
  0x14   :  { %60 = dma.hbm_to_vmem [thread:$0]  %s53_s17, 64, %s55_s20, [#allocation8], %s1129_s21, %s1129_s21, %s1130_s22  }
  0x15   :  { %s102_s27 = sshll.u32 %s1379_s6, 4  ;;  %s1138_s3 = smov [#allocation15]   ;;  %s103_s27 = int_to_ptr.hbm [resolvable:$true] %s102_s27 }
  0x16   :  { %84 = dma.hbm_to_vmem [thread:$0]  %s80_s0, 16, %s82_s2, [#allocation11]  }
  0x17   :  { %s104_s28 = sshll.u32 %s1138_s3, 4  ;;  %s105_s28 = int_to_ptr.vmem [resolvable:$true] %s104_s28 }
  0x18   :  { %110 = dma.hbm_to_vmem [thread:$0]  %s103_s27, 512, %s105_s28, [#allocation14], %s1132_s25, %s1132_s25, %s1133_s1  }
  0x19   :  { %1100 = dma.done.wait [#allocation5], 256  }
  0x1a   :  { %1101 = vsyncadd [#allocation5], 4294967040 }
  0x1b   :  { %1102 = dma.done.wait [#allocation8], 320  }
  0x1c   :  { %1103 = vsyncadd [#allocation8], 4294966976 }
  0x1d   :  { %1104 = dma.done.wait [#allocation11], 144  }
  0x1e   :  { %1105 = vsyncadd [#allocation11], 4294967152 }
  0x1f   :  { %1106 = dma.done.wait [#allocation14], 1024  }
  0x20   :  { %1107 = vsyncadd [#allocation14], 4294966272  ;;  %vm150_vm0 = vcmask 254976   ;;  %v148_v0 = vld [vmem:[#allocation9] sm:$0x3]  ;;  %v793_v7 = vld [vmem:[#allocation10] sm:$0xff] }
  0x21   :  { %v149_v1 = vld [vmem:[#allocation9 + $0x2] sm:$0x3]  ;;  %v1241_v2 = vld [vmem:[#allocation15] sm:$0xf]  ;;  %151 = vst.msk [vmem:[#allocation17] sm:$0x3] %vm150_vm0, %v148_v0  ;;  %212 = vmatpush.bf16.msra.mxu0 %v793_v7 }
  0x22   :  { %v1244_v3 = vld [vmem:[#allocation15] sm:$0xf0]  ;;  %v1246_v4 = vld [vmem:[#allocation15 + $0x8] sm:$0xf]  ;;  %152 = vst.msk [vmem:[#allocation17 + $0x2] sm:$0x3] %vm150_vm0, %v149_v1 }
  0x23   :  { %v1249_v5 = vld [vmem:[#allocation15 + $0x8] sm:$0xf0]  ;;  %v1254_v6 = vld [vmem:[%s1381_s8] sm:$0x1]  ;;  %v154_v9 = vld [vmem:[#allocation4 + $0x2] sm:$0x3] }
  0x24   :  { %v153_v8 = vld [vmem:[#allocation4] sm:$0x3]  ;;  %v155_v10 = vld [vmem:[#allocation4 + $0x4] sm:$0x3]  ;;  %v156_v11 = vld [vmem:[#allocation4 + $0x6] sm:$0x3] }
  0x25   :  { %169 = vst [vmem:[#allocation1] ss:$4 sm:$0xff] %v153_v8  ;;  %v157_v12 = vld [vmem:[#allocation4 + $0x8] sm:$0x3]  ;;  %v158_v14 = vld [vmem:[#allocation4 + $0xa] sm:$0x3] }
  0x26   :  { %171 = vst [vmem:[#allocation1 + $0x1] ss:$4 sm:$0xff] %v154_v9  ;;  %v159_v15 = vld [vmem:[#allocation4 + $0xc] sm:$0x3]  ;;  %v160_v16 = vld [vmem:[#allocation4 + $0xe] sm:$0x3] }
  0x27   :  { %173 = vst [vmem:[#allocation1 + $0x2] ss:$4 sm:$0xff] %v155_v10  ;;  %vm201_vm1 = vcmask 130048   ;;  %v853_v20 = vld [vmem:[#allocation12] ss:$0 sm:$0xff]  ;;  %v795_v21 = vld [vmem:[#allocation13 + $0x8] sm:$0xff] }
  0x28   :  { %v1256_v13 = vld [vmem:[#allocation17] sm:$0x3]   ;;  %175 = vst [vmem:[#allocation1 + $0x3] ss:$4 sm:$0xff] %v156_v11  ;;  %327 = vmatpush.bf16.msra.mxu1 %v795_v21  ;;  %v794_v22 = vld [vmem:[#allocation13] sm:$0xff]  ;;  %vm257_vm2 = vcmask 253952  }
  0x29   :  { %177 = vst [vmem:[#allocation1 + $0x20] ss:$4 sm:$0xff] %v157_v12  ;;  %v233_v24 = vld [vmem:[#allocation7] sm:$0x3]  ;;  %v234_v26 = vld [vmem:[#allocation7 + $0x2] sm:$0x3] }
  0x2a   :  { %179 = vst [vmem:[#allocation1 + $0x21] ss:$4 sm:$0xff] %v158_v14  ;;  %v235_v27 = vld [vmem:[#allocation7 + $0x4] sm:$0x3]  ;;  %v236_v28 = vld [vmem:[#allocation7 + $0x6] sm:$0x3] }
  0x2b   :  { %181 = vst [vmem:[#allocation1 + $0x22] ss:$4 sm:$0xff] %v159_v15  ;;  %v237_v41 = vld [vmem:[#allocation7 + $0x8] sm:$0x3]  ;;  %v238_v43 = vld [vmem:[#allocation7 + $0xa] sm:$0x3] }
  0x2c   :  { %183 = vst [vmem:[#allocation1 + $0x23] ss:$4 sm:$0xff] %v160_v16  ;;  %328 = vmatpush.bf16.msra.mxu1 %v794_v22  ;;  %v239_v44 = vld [vmem:[#allocation7 + $0xc] sm:$0x3]  ;;  %v240_v45 = vld [vmem:[#allocation7 + $0xe] sm:$0x3] }
  0x2d   :  { %vm318_vm3 = vcmask 261120   ;;  %v854_v7 = vld [vmem:[%s1380_s7] ss:$0 sm:$0xff]  ;;  %vm349_vm4 = vcmask 779264   ;;  %s1281_s29 = smov 0  }
  0x2f   :  { %v184_v17 = vld.sshfl [vmem:[#allocation1] sm:$0xff pattern:$0x73625140] }
  0x33   :  { %v185_v18 = vld.sshfl [vmem:[#allocation1 + $0x20] sm:$0xff pattern:$0x73625140] }
  0x34   :  { %v188_v19 = vpack.c.bf16 %v185_v18, %v184_v17 }
  0x36   :  { %750 = vmatmul.msk.bf16.vlgmr.msra.gmra.mxu0 %vm201_vm1, %v188_v19 }
  0xb3   :  { %v214_v23 = vpop.f32.mrf.mxu0 }
  0xb4   :  { %v215_v25 = vadd.f32 %v853_v20, %v214_v23 }
  0xb6   :  { %v221_v29 = vrot.slane %v215_v25, 2  ;;  %v222_v30 = vrot.slane %v215_v25, 4  ;;  %v223_v31 = vrot.slane %v215_v25, 6  ;;  %v241_v32 = vadd.f32 %v233_v24, %v215_v25 }
  0xb8   :  { %v242_v33 = vadd.f32 %v234_v26, %v221_v29  ;;  %v243_v34 = vadd.f32 %v235_v27, %v222_v30  ;;  %v244_v35 = vadd.f32 %v236_v28, %v223_v31  ;;  %v249_v36 = vpack.c.bf16 %v241_v32, %v241_v32 }
  0xba   :  { %v250_v37 = vpack.c.bf16 %v242_v33, %v242_v33  ;;  %v251_v38 = vpack.c.bf16 %v243_v34, %v243_v34  ;;  %v252_v39 = vpack.c.bf16 %v244_v35, %v244_v35  ;;  %258 = vst.msk [vmem:[#allocation2] sm:$0x1] %vm257_vm2, %v249_v36 }
  0xbb   :  { %v216_v40 = vpop.f32.mrf.mxu0 }
  0xbc   :  { %259 = vst.msk [vmem:[#allocation2 + $0x1] sm:$0x1] %vm257_vm2, %v250_v37  ;;  %v217_v42 = vadd.f32 %v853_v20, %v216_v40 }
  0xbd   :  { %260 = vst.msk [vmem:[#allocation2 + $0x2] sm:$0x1] %vm257_vm2, %v251_v38 }
  0xbe   :  { %261 = vst.msk [vmem:[#allocation2 + $0x3] sm:$0x1] %vm257_vm2, %v252_v39  ;;  %v224_v46 = vrot.slane %v217_v42, 2  ;;  %v225_v47 = vrot.slane %v217_v42, 4  ;;  %v226_v48 = vrot.slane %v217_v42, 6  ;;  %v245_v49 = vadd.f32 %v237_v41, %v217_v42 }
  0xc0   :  { %v246_v50 = vadd.f32 %v238_v43, %v224_v46  ;;  %v247_v51 = vadd.f32 %v239_v44, %v225_v47  ;;  %v253_v52 = vpack.c.bf16 %v245_v49, %v245_v49  ;;  %v248_v54 = vadd.f32 %v240_v45, %v226_v48 }
  0xc1   :  { %v266_v53 = vld [vmem:[#allocation2] sm:$0x1] }
  0xc2   :  { %283 = vst [vmem:[#allocation1] ss:$9 sm:$0xff] %v266_v53  ;;  %v254_v56 = vpack.c.bf16 %v246_v50, %v246_v50  ;;  %v255_v58 = vpack.c.bf16 %v247_v51, %v247_v51  ;;  %v256_v60 = vpack.c.bf16 %v248_v54, %v248_v54 }
  0xc3   :  { %v267_v55 = vld [vmem:[#allocation2 + $0x1] sm:$0x1]  ;;  %262 = vst.msk [vmem:[#allocation2 + $0x4] sm:$0x1] %vm257_vm2, %v253_v52 }
  0xc4   :  { %v268_v57 = vld [vmem:[#allocation2 + $0x2] sm:$0x1]  ;;  %286 = vst [vmem:[#allocation1 + $0x1] ss:$9 sm:$0xff] %v267_v55 }
  0xc5   :  { %v269_v59 = vld [vmem:[#allocation2 + $0x3] sm:$0x1]  ;;  %289 = vst [vmem:[#allocation1 + $0x2] ss:$9 sm:$0xff] %v268_v57 }
  0xc6   :  { %292 = vst [vmem:[#allocation1 + $0x3] ss:$9 sm:$0xff] %v269_v59 }
  0xc7   :  { %263 = vst.msk [vmem:[#allocation2 + $0x5] sm:$0x1] %vm257_vm2, %v254_v56 }
  0xc8   :  { %264 = vst.msk [vmem:[#allocation2 + $0x6] sm:$0x1] %vm257_vm2, %v255_v58 }
  0xc9   :  { %265 = vst.msk [vmem:[#allocation2 + $0x7] sm:$0x1] %vm257_vm2, %v256_v60 }
  0xca   :  { %v270_v61 = vld [vmem:[#allocation2 + $0x4] sm:$0x1] }
  0xcb   :  { %295 = vst [vmem:[#allocation1 + $0x4] ss:$9 sm:$0xff] %v270_v61 }
  0xce   :  { %v271_v62 = vld [vmem:[#allocation2 + $0x5] sm:$0x1] }
  0xcf   :  { %v272_v63 = vld [vmem:[#allocation2 + $0x6] sm:$0x1]  ;;  %298 = vst [vmem:[#allocation1 + $0x5] ss:$9 sm:$0xff] %v271_v62 }
  0xd0   :  { %v273_v0 = vld [vmem:[#allocation2 + $0x7] sm:$0x1]  ;;  %301 = vst [vmem:[#allocation1 + $0x6] ss:$9 sm:$0xff] %v272_v63 }
  0xd1   :  { %304 = vst [vmem:[#allocation1 + $0x7] ss:$9 sm:$0xff] %v273_v0 }
  0xd8   :  { %v305_v1 = vld [vmem:[#allocation1] sm:$0xff] }
  0xd9   :  { %759 = vmatmul.msk.bf16.vlgmr.msra.gmra.mxu1 %vm318_vm3, %v305_v1 }
 0x156   :  { %v330_v8 = vpop.f32.mrf.mxu1 }
 0x157   :  { %v331_v9 = vadd.f32 %v854_v7, %v330_v8 }
 0x159   :  { %v337_v10 = vrot.slane %v331_v9, 2  ;;  %v338_v11 = vrot.slane %v331_v9, 4  ;;  %v339_v12 = vrot.slane %v331_v9, 6  ;;  %350 = vst.msk [vmem:[#allocation3] sm:$0x3] %vm349_vm4, %v331_v9 }
 0x15b   :  { %351 = vst.msk [vmem:[#allocation3 + $0x2] sm:$0x3] %vm349_vm4, %v337_v10 }
 0x15c   :  { %352 = vst.msk [vmem:[#allocation3 + $0x4] sm:$0x3] %vm349_vm4, %v338_v11 }
 0x15d   :  { %353 = vst.msk [vmem:[#allocation3 + $0x6] sm:$0x3] %vm349_vm4, %v339_v12 }
 0x15e   :  { %v332_v14 = vpop.f32.mrf.mxu1 }
 0x15f   :  { %v333_v15 = vadd.f32 %v854_v7, %v332_v14 }
 0x161   :  { %v340_v16 = vrot.slane %v333_v15, 2  ;;  %v341_v17 = vrot.slane %v333_v15, 4  ;;  %v342_v18 = vrot.slane %v333_v15, 6  ;;  %354 = vst.msk [vmem:[#allocation3 + $0x8] sm:$0x3] %vm349_vm4, %v333_v15 }
 0x163   :  { %355 = vst.msk [vmem:[#allocation3 + $0xa] sm:$0x3] %vm349_vm4, %v340_v16 }
 0x164   :  { %356 = vst.msk [vmem:[#allocation3 + $0xc] sm:$0x3] %vm349_vm4, %v341_v17 }
 0x165   :  { %357 = vst.msk [vmem:[#allocation3 + $0xe] sm:$0x3] %vm349_vm4, %v342_v18 }
 0x166 LB: > { %v768_v19 = vor.u32 %v1249_v5, %v1246_v4  ;;  %v424_v20 = vperm.slane %v1254_v6, 0  ;;  %v764_v21 = vor.u32 %v1244_v3, %v1241_v2  ;;  %s1139_s30 = smov 64   ;;  %v374_v22 = vpack.c.bf16 %v1114_v13, %v1114_v13  ;;  %s760_s11 = sshll.u32 %s1118_s29, 1  ;;  %s1118_s29 = sphi %s1281_s29, %s369_s29   ;;  %v1114_v13 = vphi %v1256_v13, %v1384_v13  }
 0x167   : > { %s372_s12 = scalar_lea.vmem [#allocation3], %s760_s11  ;;  %s1140_s13 = smov 32   ;;  %vm458_vm9 = vcmask 1040384  }
 0x168   : > { %396 = vmatpush.bf16.msra.mxu0 %v768_v19  ;;  %425 = vrot.lane.b32.xlu0 %v424_v20, %s1139_s30  ;;  %s466_s14 = scalar_lea.vmem [#allocation2], %s1118_s29  ;;  %s369_s29 = sadd.s32 1, %s1118_s29  }
 0x169   : > { %p366_p0 = scmp.ge.s32.totalorder %s369_s29, 8  }
 0x16a   :  { %v798_v60 = vld [vmem:[#allocation13 + $0x10] sm:$0xff] (%p366_p0)  ;;  %v1314_v5 = vld [vmem:[#allocation15 + $0x18] sm:$0xf] (%p366_p0)  ;;  %v1316_v6 = vld [vmem:[#allocation15 + $0x18] sm:$0xf0] (%p366_p0) }
 0x16b   :  { %v1310_v3 = vld [vmem:[#allocation15 + $0x10] sm:$0xf] (%p366_p0)  ;;  %v1312_v4 = vld [vmem:[#allocation15 + $0x10] sm:$0xf0] (%p366_p0)  ;;  %v574_v9 = vld [vmem:[#allocation17 + $0x2] sm:$0x3] (%p366_p0)  }
 0x16c   : > { %397 = vmatpush.bf16.msra.mxu0 %v764_v21  ;;  %v373_v27 = vld [vmem:[%s372_s12] sm:$0x3] }
 0x16d   :  { %v1321_v8 = vld [vmem:[%s1381_s8 + $0x1] sm:$0x1] (%p366_p0) }
 0x16e   :  { %v861_v10 = vld [vmem:[%s1380_s7 + $0x1] ss:$0 sm:$0xff] (%p366_p0)  ;;  %s1336_s7 = smov (%p366_p0), 0  }
 0x16f   : > { %769 = vmatmul.msk.bf16.vlgmr.msra.gmra.mxu0 %vm318_vm3, %v374_v22 }
 0x1da   : > { %v426_v23 = vpop.permute.xlu0 %425 }
 0x1ec   : > { %v399_v24 = vpop.f32.mrf.mxu0 }
 0x1ed   : > { %v428_v25 = vadd.f32 %v426_v23, %v399_v24  ;;  %v403_v28 = vadd.f32 %v399_v24, %v373_v27 }
 0x1ef   : > { %430 = vrot.lane.b32.xlu0 %v428_v25, %s1139_s30  ;;  %v770_v29 = vmul.f32 -1.442695, %v403_v28 }
 0x1f1   : > { %855 = vpow2.f32 %v770_v29 }
 0x1f4   : > { %v401_v26 = vpop.f32.mrf.mxu0 }
 0x1f7   : > { %v856_v30 = vpop.eup %855 }
 0x1f8   : > { %v407_v31 = vadd.f32 1.0, %v856_v30 }
 0x1fa   : > { %857 = vrcp.f32 %v407_v31  ;;  %v419_v37 = vand.u32 2147483648, %v407_v31  ;;  %vm413_vm6 = vweird.f32 %v407_v31  ;;  %v417_v38 = vand.u32 2147483647, %v407_v31 }
 0x1fc   : > { %v420_v40 = vor.u32 1.1754944e-38, %v419_v37  ;;  %vm418_vm8 = vcmp.eq.f32.partialorder %v417_v38, 8.507059e+37 }
 0x200   : > { %v858_v32 = vpop.eup %857 }
 0x201   : > { %v409_v33 = vmul.f32 %v858_v32, %v407_v31  ;;  %vm414_vm5 = vweird.f32 %v858_v32 }
 0x202   : > { %vm415_vm7 = vmor %vm413_vm6, %vm414_vm5 }
 0x203   : > { %v410_v34 = vsub.f32 1.0, %v409_v33 }
 0x205   : > { %v411_v35 = vmul.f32 %v858_v32, %v410_v34 }
 0x207   : > { %v412_v36 = vadd.f32 %v858_v32, %v411_v35 }
 0x209   : > { %v416_v39 = vsel %vm415_vm7, %v858_v32, %v412_v36 }
 0x20a   : > { %v421_v42 = vsel %vm418_vm8, %v420_v40, %v416_v39 }
 0x261   : > { %v431_v41 = vpop.permute.xlu0 %430 }
 0x262   : > { %v433_v43 = vmul.f32 %v431_v41, %v421_v42 }
 0x264   : > { %435 = vrot.lane.b32.xlu1 %v433_v43, %s1139_s30 }
 0x2d6   : > { %v436_v44 = vpop.permute.xlu1 %435 }
 0x2d7   : > { %v438_v45 = vadd.f32 %v436_v44, %v373_v27 }
 0x2d9   : > { %859 = vtanh.f32 %v438_v45 }
 0x2df   : > { %v860_v46 = vpop.eup %859 }
 0x2e0   : > { %441 = vrot.lane.b32.xlu1 %v860_v46, %s1139_s30 }
 0x352   : > { %v442_v47 = vpop.permute.xlu1 %441 }
 0x353   : > { %v444_v48 = vsub.f32 %v1114_v13, %v442_v47 }
 0x355   : > { %446 = vrot.lane.b32.xlu2 %v444_v48, %s1140_s13 }
 0x3af   : > { %v447_v49 = vpop.permute.xlu2 %446 }
 0x3b0   : > { %v449_v50 = vmul.f32 %v447_v49, %v421_v42 }
 0x3b2   : > { %451 = vrot.lane.b32.xlu2 %v449_v50, %s1140_s13 }
 0x40c   : > { %v452_v51 = vpop.permute.xlu2 %451 }
 0x40d   : > { %v454_v52 = vadd.f32 %v860_v46, %v452_v51 }
 0x40f   : > { %v455_v53 = vpack.c.bf16 %v454_v52, %v454_v52  ;;  %469 = vrot.lane.b32.xlu1 %v454_v52, %s1139_s30 }
 0x411   : > { %v457_v54 = vrot.slane %v455_v53, 3 }
 0x413   : > { %v461_v55 = vsel %vm458_vm9, %v455_v53, %v457_v54 }
 0x414   : > { %463 = vrot.lane.b32.xlu0 %v461_v55, %s1139_s30 }
 0x481   : > { %v470_v56 = vpop.permute.xlu1 %469  }
 0x482   : > { %v1384_v13 = vmov %v470_v56  ;;  %473 = vst.msk [vmem:[#allocation17] sm:$0x3] (%p366_p0), %vm150_vm0, %v470_v56 }
 0x483   :  { %368 = sbr.rel (!%p366_p0) target bundleno = 358 (0x166), region = 140  ;;  %v799_v13 = vld [vmem:[#allocation13 + $0x18] sm:$0xff] (%p366_p0) }
 0x484   :  { %536 = vmatpush.bf16.msra.mxu0 (%p366_p0), %v799_v13 }
 0x486   : > { %v464_v57 = vpop.permute.xlu0 %463 }
 0x487   : > { %467 = vst.msk [vmem:[%s466_s14] sm:$0x1] %vm257_vm2, %v464_v57 }
 0x488   :  { %537 = vmatpush.bf16.msra.mxu0 %v798_v60 }
 0x48e   :  { %v474_v58 = vld [vmem:[#allocation2] sm:$0x1]  ;;  %v475_v59 = vld [vmem:[#allocation2 + $0x1] sm:$0x1]  ;;  %v476_v61 = vld [vmem:[#allocation2 + $0x2] sm:$0x1] }
 0x48f   :  { %v477_v62 = vld [vmem:[#allocation2 + $0x3] sm:$0x1]  ;;  %493 = vst [vmem:[#allocation1] ss:$9 sm:$0xff] %v474_v58  ;;  %v478_v63 = vld [vmem:[#allocation2 + $0x4] sm:$0x1] }
 0x490   :  { %496 = vst [vmem:[#allocation1 + $0x1] ss:$9 sm:$0xff] %v475_v59  ;;  %v479_v0 = vld [vmem:[#allocation2 + $0x5] sm:$0x1]  ;;  %v480_v1 = vld [vmem:[#allocation2 + $0x6] sm:$0x1] }
 0x491   :  { %499 = vst [vmem:[#allocation1 + $0x2] ss:$9 sm:$0xff] %v476_v61  ;;  %v481_v7 = vld [vmem:[#allocation2 + $0x7] sm:$0x1] }
 0x492   :  { %502 = vst [vmem:[#allocation1 + $0x3] ss:$9 sm:$0xff] %v477_v62 }
 0x493   :  { %505 = vst [vmem:[#allocation1 + $0x4] ss:$9 sm:$0xff] %v478_v63 }
 0x494   :  { %508 = vst [vmem:[#allocation1 + $0x5] ss:$9 sm:$0xff] %v479_v0 }
 0x495   :  { %511 = vst [vmem:[#allocation1 + $0x6] ss:$9 sm:$0xff] %v480_v1 }
 0x496   :  { %514 = vst [vmem:[#allocation1 + $0x7] ss:$9 sm:$0xff] %v481_v7 }
 0x49d   :  { %v515_v2 = vld [vmem:[#allocation1] sm:$0xff] }
 0x49e   :  { %780 = vmatmul.msk.bf16.vlgmr.msra.gmra.mxu0 %vm318_vm3, %v515_v2 }
 0x51b   :  { %v539_v11 = vpop.f32.mrf.mxu0 }
 0x51c   :  { %v540_v12 = vadd.f32 %v861_v10, %v539_v11 }
 0x51e   :  { %v546_v14 = vrot.slane %v540_v12, 2  ;;  %v547_v15 = vrot.slane %v540_v12, 4  ;;  %v548_v16 = vrot.slane %v540_v12, 6  ;;  %558 = vst.msk [vmem:[#allocation3] sm:$0x3] %vm349_vm4, %v540_v12 }
 0x520   :  { %559 = vst.msk [vmem:[#allocation3 + $0x2] sm:$0x3] %vm349_vm4, %v546_v14 }
 0x521   :  { %560 = vst.msk [vmem:[#allocation3 + $0x4] sm:$0x3] %vm349_vm4, %v547_v15 }
 0x522   :  { %561 = vst.msk [vmem:[#allocation3 + $0x6] sm:$0x3] %vm349_vm4, %v548_v16 }
 0x523   :  { %v541_v17 = vpop.f32.mrf.mxu0 }
 0x524   :  { %v542_v18 = vadd.f32 %v861_v10, %v541_v17 }
 0x526   :  { %v549_v19 = vrot.slane %v542_v18, 2  ;;  %v550_v20 = vrot.slane %v542_v18, 4  ;;  %v551_v21 = vrot.slane %v542_v18, 6  ;;  %562 = vst.msk [vmem:[#allocation3 + $0x8] sm:$0x3] %vm349_vm4, %v542_v18 }
 0x528   :  { %563 = vst.msk [vmem:[#allocation3 + $0xa] sm:$0x3] %vm349_vm4, %v549_v19 }
 0x529   :  { %564 = vst.msk [vmem:[#allocation3 + $0xc] sm:$0x3] %vm349_vm4, %v550_v20 }
 0x52a   :  { %565 = vst.msk [vmem:[#allocation3 + $0xe] sm:$0x3] %vm349_vm4, %v551_v21 }
 0x52b LB: > { %v790_v22 = vor.u32 %v1316_v6, %v1314_v5  ;;  %v635_v23 = vperm.slane %v1321_v8, 0  ;;  %v786_v24 = vor.u32 %v1312_v4, %v1310_v3  ;;  %s1141_s8 = smov 64   ;;  %v585_v25 = vpack.c.bf16 %v1122_v9, %v1122_v9  ;;  %s782_s18 = sshll.u32 %s1126_s7, 1  ;;  %s1126_s7 = sphi %s1336_s7, %s580_s7   ;;  %v1122_v9 = vphi %v574_v9, %v1385_v9  }
 0x52c   : > { %s583_s0 = scalar_lea.vmem [#allocation3], %s782_s18  ;;  %s1142_s19 = smov 32  }
 0x52d   : > { %607 = vmatpush.bf16.msra.mxu0 %v790_v22  ;;  %636 = vrot.lane.b32.xlu0 %v635_v23, %s1141_s8  ;;  %s677_s20 = scalar_lea.vmem [#allocation16], %s1126_s7  ;;  %s580_s7 = sadd.s32 1, %s1126_s7  }
 0x52e   : > { %p577_p1 = scmp.ge.s32.totalorder %s580_s7, 8  }
 0x52f   :  { %s690_s24 = sshll.u32 (%p577_p1), %s1382_s9, 4  ;;  %s1143_s26 = smov (%p577_p1), [#allocation16]   ;;  %s691_s24 = int_to_ptr.hbm [resolvable:$true] %s690_s24 }
 0x530   :  { %s688_s27 = sshll.u32 (%p577_p1), %s1143_s26, 4  ;;  %s1144_s3 = smov (%p577_p1), 16   ;;  %s689_s27 = int_to_ptr.vmem [resolvable:$true] %s688_s27 }
 0x531   : > { %608 = vmatpush.bf16.msra.mxu0 %v786_v24  ;;  %v584_v30 = vld [vmem:[%s583_s0] sm:$0x3]  ;;  %s1145_s28 = smov (%p577_p1), 1   ;;  %s1146_s4 = smov (%p577_p1), [#allocation17]  }
 0x532   :  { %s701_s6 = sshll.u32 (%p577_p1), %s1146_s4, 4  ;;  %s703_s29 = sshll.u32 (%p577_p1), %s1383_s10, 4  ;;  %s702_s6 = int_to_ptr.vmem [resolvable:$true] %s701_s6  ;;  %s704_s29 = int_to_ptr.hbm [resolvable:$true] %s703_s29 }
 0x534   : > { %791 = vmatmul.msk.bf16.vlgmr.msra.gmra.mxu0 %vm318_vm3, %v585_v25 }
 0x59f   : > { %v637_v26 = vpop.permute.xlu0 %636 }
 0x5b1   : > { %v610_v27 = vpop.f32.mrf.mxu0 }
 0x5b2   : > { %v639_v28 = vadd.f32 %v637_v26, %v610_v27  ;;  %v614_v31 = vadd.f32 %v610_v27, %v584_v30 }
 0x5b4   : > { %641 = vrot.lane.b32.xlu0 %v639_v28, %s1141_s8  ;;  %v792_v32 = vmul.f32 -1.442695, %v614_v31 }
 0x5b6   : > { %862 = vpow2.f32 %v792_v32 }
 0x5b9   : > { %v612_v29 = vpop.f32.mrf.mxu0 }
 0x5bc   : > { %v863_v33 = vpop.eup %862 }
 0x5bd   : > { %v618_v34 = vadd.f32 1.0, %v863_v33 }
 0x5bf   : > { %864 = vrcp.f32 %v618_v34  ;;  %v630_v40 = vand.u32 2147483648, %v618_v34  ;;  %vm624_vm11 = vweird.f32 %v618_v34  ;;  %v628_v41 = vand.u32 2147483647, %v618_v34 }
 0x5c1   : > { %v631_v43 = vor.u32 1.1754944e-38, %v630_v40  ;;  %vm629_vm13 = vcmp.eq.f32.partialorder %v628_v41, 8.507059e+37 }
 0x5c5   : > { %v865_v35 = vpop.eup %864 }
 0x5c6   : > { %v620_v36 = vmul.f32 %v865_v35, %v618_v34  ;;  %vm625_vm10 = vweird.f32 %v865_v35 }
 0x5c7   : > { %vm626_vm12 = vmor %vm624_vm11, %vm625_vm10 }
 0x5c8   : > { %v621_v37 = vsub.f32 1.0, %v620_v36 }
 0x5ca   : > { %v622_v38 = vmul.f32 %v865_v35, %v621_v37 }
 0x5cc   : > { %v623_v39 = vadd.f32 %v865_v35, %v622_v38 }
 0x5ce   : > { %v627_v42 = vsel %vm626_vm12, %v865_v35, %v623_v39 }
 0x5cf   : > { %v632_v45 = vsel %vm629_vm13, %v631_v43, %v627_v42 }
 0x626   : > { %v642_v44 = vpop.permute.xlu0 %641 }
 0x627   : > { %v644_v46 = vmul.f32 %v642_v44, %v632_v45 }
 0x629   : > { %646 = vrot.lane.b32.xlu1 %v644_v46, %s1141_s8 }
 0x69b   : > { %v647_v47 = vpop.permute.xlu1 %646 }
 0x69c   : > { %v649_v48 = vadd.f32 %v647_v47, %v584_v30 }
 0x69e   : > { %866 = vtanh.f32 %v649_v48 }
 0x6a4   : > { %v867_v49 = vpop.eup %866 }
 0x6a5   : > { %652 = vrot.lane.b32.xlu1 %v867_v49, %s1141_s8 }
 0x717   : > { %v653_v50 = vpop.permute.xlu1 %652 }
 0x718   : > { %v655_v51 = vsub.f32 %v1122_v9, %v653_v50 }
 0x71a   : > { %657 = vrot.lane.b32.xlu2 %v655_v51, %s1142_s19 }
 0x774   : > { %v658_v52 = vpop.permute.xlu2 %657 }
 0x775   : > { %v660_v53 = vmul.f32 %v658_v52, %v632_v45 }
 0x777   : > { %662 = vrot.lane.b32.xlu2 %v660_v53, %s1142_s19 }
 0x7d1   : > { %v663_v54 = vpop.permute.xlu2 %662 }
 0x7d2   : > { %v665_v55 = vadd.f32 %v867_v49, %v663_v54 }
 0x7d4   : > { %v666_v56 = vpack.c.bf16 %v665_v55, %v665_v55  ;;  %680 = vrot.lane.b32.xlu1 %v665_v55, %s1141_s8 }
 0x7d6   : > { %v668_v57 = vrot.slane %v666_v56, 3 }
 0x7d8   : > { %v672_v13 = vsel %vm458_vm9, %v666_v56, %v668_v57 }
 0x7d9   : > { %674 = vrot.lane.b32.xlu0 %v672_v13, %s1141_s8 }
 0x846   : > { %v681_v58 = vpop.permute.xlu1 %680  }
 0x847   : > { %v1385_v9 = vmov %v681_v58  ;;  %683 = vst.msk [vmem:[#allocation17 + $0x2] sm:$0x3] (%p577_p1), %vm150_vm0, %v681_v58 }
 0x848   :  { %579 = sbr.rel (!%p577_p1) target bundleno = 1323 (0x52b), region = 151 }
 0x849   :  { %709 = dma.vmem_to_hbm [thread:$0]  (%p577_p1), %s702_s6, 64, %s704_s29, [#allocation18], %s1129_s21, %s1129_s21, %s1130_s22  }
 0x84b   : > { %v675_v59 = vpop.permute.xlu0 %674 }
 0x84c   : > { %678 = vst.msk [vmem:[%s677_s20] sm:$0x1] %vm257_vm2, %v675_v59 }
 0x84d   :  { %696 = dma.vmem_to_hbm [thread:$0]  %s689_s27, 128, %s691_s24, [#allocation6], %s1144_s3, %s1144_s3, %s1145_s28  }
 0x84e   :  { %1108 = dma.done.wait [#allocation6], 128  }
 0x84f   :  { %1109 = vsyncadd [#allocation6], 4294967168 }
 0x850   :  { %1110 = dma.done.wait [#allocation18], 64  }
 0x851   :  { %1111 = vsyncadd [#allocation18], 4294967232 }
 0x852   :  { %718 = vsyncpa [#allocation5], 1 }
 0x853   :  { %719 = vsyncpa [#allocation8], 1 }
 0x854   :  { %720 = vsyncpa [#allocation11], 1 }
 0x855   :  { %721 = vsyncpa [#allocation14], 1 }
 0x856   :  { %722 = vsyncpa [#allocation6], 1 }
 0x857   :  { %723 = vsyncpa [#allocation18], 1 }

</bundles_post_ra>
